<compile_context>
chip_gen: v7x
topology: tpu7x:2x2x1
jax: 0.10.0
libtpu: 0.0.40
codegen_flags: <defaults>
</compile_context>

<pallas_src>
import jax
import jax.numpy as jnp
import numpy as np
from jax import lax
from jax.experimental import pallas as pl
from jax.experimental.pallas import tpu as pltpu


# ------------------------------ helpers ------------------------------------- #

MASKED_BIAS = -10000.0  # GPT2Attention.masked_bias


def _layer_norm(x, g, b, eps):
    """torch.nn.LayerNorm semantics (biased variance over last dim), f32."""
    mu = jnp.mean(x, axis=-1, keepdims=True)
    var = jnp.mean((x - mu) ** 2, axis=-1, keepdims=True)
    return (x - mu) * lax.rsqrt(var + eps) * g + b


def _seq_tile(n, target=128):
    """Largest divisor of n that is <= target and a multiple of 8 (else n)."""
    if n <= target:
        return n
    for t in range(target, 7, -8):
        if n % t == 0:
            return t
    return n


def _compiler_params(semantics, est_bytes):
    # double-buffered blocks + headroom, clamped so it also fits v7x (64 MiB / TC).
    vmem = int(min(max(2 * est_bytes + (8 << 20), 32 << 20), 64 << 20))
    return pltpu.CompilerParams(dimension_semantics=semantics,
                                vmem_limit_bytes=vmem)


# ------------------------------ Pallas kernels ------------------------------- #

def ln_qkv_proj_pallas(h, lp, *, eps):
    """Fused ln_1 + c_attn: qkv = LN(h) @ Wqkv + b, returned as bf16 (B, S, 3D)."""
    B, S, D = h.shape
    TS = _seq_tile(S)

    def kernel(h_ref, g_ref, b_ref, w_ref, bias_ref, o_ref):
        x = h_ref[0]                                                  # (TS, D) f32
        xn = _layer_norm(x, g_ref[...], b_ref[...], eps).astype(jnp.bfloat16)
        qkv = jnp.dot(xn, w_ref[...],
                      preferred_element_type=jnp.float32) + bias_ref[...]
        o_ref[0] = qkv.astype(o_ref.dtype)

    est = TS * D * 4 + 2 * D * 4 + D * 3 * D * 2 + 3 * D * 4 + TS * 3 * D * 2
    return pl.pallas_call(
        kernel,
        out_shape=jax.ShapeDtypeStruct((B, S, 3 * D), jnp.bfloat16),
        grid=(B, S // TS),
        in_specs=[
            pl.BlockSpec((1, TS, D), lambda b, s: (b, s, 0)),
            pl.BlockSpec((1, D), lambda b, s: (0, 0)),
            pl.BlockSpec((1, D), lambda b, s: (0, 0)),
            pl.BlockSpec((D, 3 * D), lambda b, s: (0, 0)),
            pl.BlockSpec((1, 3 * D), lambda b, s: (0, 0)),
        ],
        out_specs=pl.BlockSpec((1, TS, 3 * D), lambda b, s: (b, s, 0)),
        compiler_params=_compiler_params(("parallel", "parallel"), est),
    )(h, lp["ln1_g"], lp["ln1_b"], lp["w_qkv"], lp["b_qkv"])


def flash_attention_pallas(q, k, v):
    """Causal flash attention. q, k, v: (B, H, S, HD) bf16 -> (B, H, S, HD) bf16."""
    B, H, S, HD = q.shape
    TQ = _seq_tile(S)
    TK = _seq_tile(S)
    inv_scale = 1.0 / (HD ** 0.5)          # scale_attn_weights (1 / sqrt(head_dim))

    def kernel(q_ref, k_ref, v_ref, o_ref, m_sc, l_sc, acc_sc):
        qi = pl.program_id(1)
        ki = pl.program_id(2)

        @pl.when(ki == 0)
        def _():
            m_sc[...] = jnp.full_like(m_sc, -1e30)
            l_sc[...] = jnp.zeros_like(l_sc)
            acc_sc[...] = jnp.zeros_like(acc_sc)

        q_start = qi * TQ
        k_start = ki * TK

        @pl.when(k_start <= q_start + (TQ - 1))       # skip fully-masked kv tiles
        def _():
            qb = q_ref[0]                             # (H, TQ, HD) bf16
            kb = k_ref[0]                             # (H, TK, HD) bf16
            s = jnp.einsum("hqd,hkd->hqk", qb, kb,
                           preferred_element_type=jnp.float32) * inv_scale
            row = q_start + lax.broadcasted_iota(jnp.int32, (TQ, TK), 0)
            col = k_start + lax.broadcasted_iota(jnp.int32, (TQ, TK), 1)
            s = jnp.where((col <= row)[None], s, jnp.float32(MASKED_BIAS))
            m_prev = m_sc[...]
            m_new = jnp.maximum(m_prev, s.max(axis=-1, keepdims=True))
            alpha = jnp.exp(m_prev - m_new)
            p = jnp.exp(s - m_new)
            l_sc[...] = alpha * l_sc[...] + p.sum(axis=-1, keepdims=True)
            acc_sc[...] = alpha * acc_sc[...] + jnp.einsum(
                "hqk,hkd->hqd", p.astype(v_ref.dtype), v_ref[0],
                preferred_element_type=jnp.float32)
            m_sc[...] = m_new

        @pl.when(ki == pl.num_programs(2) - 1)
        def _():
            o_ref[0] = (acc_sc[...] * pl.reciprocal(l_sc[...], approx=True)
                        ).astype(o_ref.dtype)

    est = (3 * H * TK * HD * 2 + H * TQ * HD * 2
           + H * TQ * (HD + 2) * 4 + H * TQ * TK * 4)
    return pl.pallas_call(
        kernel,
        out_shape=jax.ShapeDtypeStruct((B, H, S, HD), jnp.bfloat16),
        grid=(B, S // TQ, S // TK),
        in_specs=[
            pl.BlockSpec((1, H, TQ, HD), lambda b, qi, ki: (b, 0, qi, 0)),
            pl.BlockSpec((1, H, TK, HD), lambda b, qi, ki: (b, 0, ki, 0)),
            pl.BlockSpec((1, H, TK, HD), lambda b, qi, ki: (b, 0, ki, 0)),
        ],
        out_specs=pl.BlockSpec((1, H, TQ, HD), lambda b, qi, ki: (b, 0, qi, 0)),
        scratch_shapes=[
            pltpu.VMEM((H, TQ, 1), jnp.float32),      # running max
            pltpu.VMEM((H, TQ, 1), jnp.float32),      # running denom
            pltpu.VMEM((H, TQ, HD), jnp.float32),     # output accumulator
        ],
        compiler_params=_compiler_params(("parallel", "parallel", "arbitrary"), est),
    )(q, k, v)


def proj_mlp_pallas(attn, h, lp, *, eps, lnf=None):
    """attn c_proj + residual + ln_2 + MLP(relu) + residual (+ optional fused ln_f)."""
    B, S, D = h.shape
    I = lp["w_fc"].shape[1]
    TS = _seq_tile(S)
    final_ln = lnf is not None

    def kernel(attn_ref, h_ref, wproj, bproj, g2, b2, wfc, bfc, wfcp, bfcp, *rest):
        if final_ln:
            gf, bf, o_ref = rest
        else:
            (o_ref,) = rest
        a = jnp.dot(attn_ref[0], wproj[...],
                    preferred_element_type=jnp.float32) + bproj[...]
        x1 = h_ref[0] + a                                           # residual 1
        xn2 = _layer_norm(x1, g2[...], b2[...], eps).astype(jnp.bfloat16)
        ff = jnp.dot(xn2, wfc[...], preferred_element_type=jnp.float32) + bfc[...]
        ff = jnp.maximum(ff, 0.0).astype(jnp.bfloat16)              # 'relu'
        mlp = jnp.dot(ff, wfcp[...], preferred_element_type=jnp.float32) + bfcp[...]
        y = x1 + mlp                                                # residual 2
        if final_ln:
            y = _layer_norm(y, gf[...], bf[...], eps)               # fused ln_f
        o_ref[0] = y

    in_specs = [
        pl.BlockSpec((1, TS, D), lambda b, s: (b, s, 0)),   # attn (bf16)
        pl.BlockSpec((1, TS, D), lambda b, s: (b, s, 0)),   # residual h (f32)
        pl.BlockSpec((D, D), lambda b, s: (0, 0)),          # c_proj W (bf16)
        pl.BlockSpec((1, D), lambda b, s: (0, 0)),          # c_proj b
        pl.BlockSpec((1, D), lambda b, s: (0, 0)),          # ln2 gamma
        pl.BlockSpec((1, D), lambda b, s: (0, 0)),          # ln2 beta
        pl.BlockSpec((D, I), lambda b, s: (0, 0)),          # mlp c_fc W (bf16)
        pl.BlockSpec((1, I), lambda b, s: (0, 0)),          # mlp c_fc b
        pl.BlockSpec((I, D), lambda b, s: (0, 0)),          # mlp c_proj W (bf16)
        pl.BlockSpec((1, D), lambda b, s: (0, 0)),          # mlp c_proj b
    ]
    args = [attn, h, lp["w_proj"], lp["b_proj"], lp["ln2_g"], lp["ln2_b"],
            lp["w_fc"], lp["b_fc"], lp["w_fcp"], lp["b_fcp"]]
    if final_ln:
        in_specs += [pl.BlockSpec((1, D), lambda b, s: (0, 0)),
                     pl.BlockSpec((1, D), lambda b, s: (0, 0))]
        args += [lnf[0], lnf[1]]

    est = (2 * TS * D * 4 + D * D * 2 + D * I * 2 + I * D * 2
           + (6 * D + I) * 4 + TS * I * 4 + TS * D * 4)
    return pl.pallas_call(
        kernel,
        out_shape=jax.ShapeDtypeStruct((B, S, D), jnp.float32),
        grid=(B, S // TS),
        in_specs=in_specs,
        out_specs=pl.BlockSpec((1, TS, D), lambda b, s: (b, s, 0)),
        compiler_params=_compiler_params(("parallel", "parallel"), est),
    )(*args)


# ------------------------------ model wrapper -------------------------------- #

def gpt2_model_pallas(input_ids, params, *, num_heads, eps):
    """Returns last_hidden_state, matching GPT2Model.forward (no past, no masks)."""
    B, S = input_ids.shape
    pos = jnp.arange(S, dtype=jnp.int32)
    h = (jnp.take(params["wte"], input_ids, axis=0)
         + jnp.take(params["wpe"], pos, axis=0)[None])               # embd drop = id
    D = h.shape[-1]
    H = num_heads
    HD = D // H
    n_layers = len(params["layers"])

    # TODO(synk): present key/value cache (use_cache), attention_mask / head_mask /
    # token_type_ids inputs and hidden_states/attentions outputs are not materialized;
    # only last_hidden_state is produced (the hot path covered by the kernels).
    for li, lp in enumerate(params["layers"]):
        qkv = ln_qkv_proj_pallas(h, lp, eps=eps)                      # (B, S, 3D) bf16
        q, k, v = jnp.split(qkv, 3, axis=-1)

        def to_heads(t):   # layout plumbing (plain JAX): (B,S,D) -> (B,H,S,HD)
            return t.reshape(B, S, H, HD).transpose(0, 2, 1, 3)

        attn = flash_attention_pallas(to_heads(q), to_heads(k), to_heads(v))
        attn = attn.transpose(0, 2, 1, 3).reshape(B, S, D)            # merge heads
        lnf = (params["lnf_g"], params["lnf_b"]) if li == n_layers - 1 else None
        h = proj_mlp_pallas(attn, h, lp, eps=eps, lnf=lnf)
    return h


# ------------------------------ pure-JAX reference --------------------------- #

def gpt2_model_ref(input_ids, params, *, num_heads, eps):
    B, S = input_ids.shape
    pos = jnp.arange(S, dtype=jnp.int32)
    h = (jnp.take(params["wte"], input_ids, axis=0)
         + jnp.take(params["wpe"], pos, axis=0)[None])
    D = h.shape[-1]
    H = num_heads
    HD = D // H
    inv_scale = 1.0 / (HD ** 0.5)
    causal = jnp.tril(jnp.ones((S, S), dtype=bool))[None, None]

    for lp in params["layers"]:
        xn = _layer_norm(h, lp["ln1_g"], lp["ln1_b"], eps).astype(jnp.bfloat16)
        qkv = (jnp.dot(xn, lp["w_qkv"], preferred_element_type=jnp.float32)
               + lp["b_qkv"]).astype(jnp.bfloat16)
        q, k, v = jnp.split(qkv, 3, axis=-1)

        def to_heads(t):
            return t.reshape(B, S, H, HD).transpose(0, 2, 1, 3)

        q, k, v = to_heads(q), to_heads(k), to_heads(v)
        s = jnp.einsum("bhqd,bhkd->bhqk", q, k,
                       preferred_element_type=jnp.float32) * inv_scale
        s = jnp.where(causal, s, MASKED_BIAS)
        m = s.max(axis=-1, keepdims=True)
        e = jnp.exp(s - m)
        denom = e.sum(axis=-1, keepdims=True)
        o = jnp.einsum("bhqk,bhkd->bhqd", e.astype(jnp.bfloat16), v,
                       preferred_element_type=jnp.float32) / denom
        attn = o.transpose(0, 2, 1, 3).reshape(B, S, D).astype(jnp.bfloat16)
        a = jnp.dot(attn, lp["w_proj"], preferred_element_type=jnp.float32) + lp["b_proj"]
        h = h + a
        xn2 = _layer_norm(h, lp["ln2_g"], lp["ln2_b"], eps).astype(jnp.bfloat16)
        ff = jnp.dot(xn2, lp["w_fc"], preferred_element_type=jnp.float32) + lp["b_fc"]
        ff = jnp.maximum(ff, 0.0).astype(jnp.bfloat16)
        h = h + (jnp.dot(ff, lp["w_fcp"], preferred_element_type=jnp.float32) + lp["b_fcp"])
    return _layer_norm(h, params["lnf_g"], params["lnf_b"], eps)


# ------------------------------ param init ----------------------------------- #

def init_params(key, *, vocab, max_pos, D, L, I):
    def nrm(k, shape, std=0.02, dtype=jnp.float32):
        return (std * jax.random.normal(k, shape, jnp.float32)).astype(dtype)

    ks = iter(jax.random.split(key, 4 + 12 * L))
    params = {
        "wte": nrm(next(ks), (vocab, D)),
        "wpe": nrm(next(ks), (max_pos, D)),
        "lnf_g": 1.0 + nrm(next(ks), (1, D), 0.1),
        "lnf_b": nrm(next(ks), (1, D), 0.1),
        "layers": [],
    }
    for _ in range(L):
        params["layers"].append({
            "ln1_g": 1.0 + nrm(next(ks), (1, D), 0.1),
            "ln1_b": nrm(next(ks), (1, D), 0.1),
            "w_qkv": nrm(next(ks), (D, 3 * D), dtype=jnp.bfloat16),
            "b_qkv": nrm(next(ks), (1, 3 * D), 0.1),
            "w_proj": nrm(next(ks), (D, D), dtype=jnp.bfloat16),
            "b_proj": nrm(next(ks), (1, D), 0.1),
            "ln2_g": 1.0 + nrm(next(ks), (1, D), 0.1),
            "ln2_b": nrm(next(ks), (1, D), 0.1),
            "w_fc": nrm(next(ks), (D, I), dtype=jnp.bfloat16),
            "b_fc": nrm(next(ks), (1, I), 0.1),
            "w_fcp": nrm(next(ks), (I, D), dtype=jnp.bfloat16),
            "b_fcp": nrm(next(ks), (1, D), 0.1),
        })
    return params


# ------------------------------ main ------------------------------------------ #

if __name__ == "__main__":
    # small GPT-2 config: hidden=32, heads=4, layers=2, seq=8, batch=2, vocab=50
    B, S, D, H, L = 2, 8, 32, 4, 2
    VOCAB, MAX_POS = 50, 16
    INNER = 4 * D                       # n_inner = None -> 4 * hidden
    EPS = 1e-5                          # layer_norm_epsilon

    key = jax.random.PRNGKey(0)
    k_ids, k_params = jax.random.split(key)
    input_ids = jax.random.randint(k_ids, (B, S), 0, VOCAB, dtype=jnp.int32)
    params = init_params(k_params, vocab=VOCAB, max_pos=MAX_POS, D=D, L=L, I=INNER)

    fwd = jax.jit(lambda ids, p: gpt2_model_pallas(ids, p, num_heads=H, eps=EPS))
    out = jax.block_until_ready(fwd(input_ids, params))

    ref = gpt2_model_ref(input_ids, params, num_heads=H, eps=EPS)
    # Tolerance covers MXU accumulation order, EUP exp ulps and the approximate
    # reciprocal in the flash normalization; bf16 casts are identical in both paths.
    np.testing.assert_allclose(np.asarray(out, dtype=np.float32),
                               np.asarray(ref, dtype=np.float32),
                               rtol=5e-3, atol=5e-3)
    print("KERNEL_OK")
</pallas_src>

<mosaic_0001>
module attributes {stable_mosaic.version = 11 : i64} {
  func.func @kernel(%arg0: i32, %arg1: i32, %arg2: memref<1x8x32xf32, #tpu.memory_space<vmem>>, %arg3: memref<1x32xf32, #tpu.memory_space<vmem>>, %arg4: memref<1x32xf32, #tpu.memory_space<vmem>>, %arg5: memref<32x96xbf16, #tpu.memory_space<vmem>>, %arg6: memref<1x96xf32, #tpu.memory_space<vmem>>, %arg7: memref<1x8x96xbf16, #tpu.memory_space<vmem>>) attributes {dimension_semantics = [#tpu.dimension_semantics<parallel>, #tpu.dimension_semantics<parallel>], iteration_bounds = array<i64: 2, 1>, scalar_prefetch = 0 : i64, scratch_operands = 0 : i64, tpu.core_type = #tpu.core_type<tc>, window_params = [{transform_indices = @transform_0, window_bounds = array<i64: 1, 8, 32>}, {pipeline_mode = #tpu.pipeline_mode<synchronous>, transform_indices = @transform_1, window_bounds = array<i64: 1, 32>}, {pipeline_mode = #tpu.pipeline_mode<synchronous>, transform_indices = @transform_2, window_bounds = array<i64: 1, 32>}, {pipeline_mode = #tpu.pipeline_mode<synchronous>, transform_indices = @transform_3, window_bounds = array<i64: 32, 96>}, {pipeline_mode = #tpu.pipeline_mode<synchronous>, transform_indices = @transform_4, window_bounds = array<i64: 1, 96>}, {transform_indices = @transform_5, window_bounds = array<i64: 1, 8, 96>}]} {
    %c0 = arith.constant 0 : index
    %c0_0 = arith.constant 0 : index
    %c0_1 = arith.constant 0 : index
    %0 = vector.load %arg2[%c0, %c0_0, %c0_1] : memref<1x8x32xf32, #tpu.memory_space<vmem>>, vector<1x8x32xf32>
    %1 = vector.shape_cast %0 : vector<1x8x32xf32> to vector<8x32xf32>
    %c0_2 = arith.constant 0 : index
    %c0_3 = arith.constant 0 : index
    %2 = vector.load %arg3[%c0_2, %c0_3] : memref<1x32xf32, #tpu.memory_space<vmem>>, vector<1x32xf32>
    %c0_4 = arith.constant 0 : index
    %c0_5 = arith.constant 0 : index
    %3 = vector.load %arg4[%c0_4, %c0_5] : memref<1x32xf32, #tpu.memory_space<vmem>>, vector<1x32xf32>
    %cst = arith.constant dense<0.000000e+00> : vector<8xf32>
    %4 = vector.multi_reduction <add>, %1, %cst [1] : vector<8x32xf32> to vector<8xf32>
    %5 = vector.shape_cast %4 : vector<8xf32> to vector<8x1xf32>
    %cst_6 = arith.constant 3.200000e+01 : f32
    %6 = vector.broadcast %cst_6 : f32 to vector<8x1xf32>
    %7 = arith.divf %5, %6 : vector<8x1xf32>
    %8 = vector.broadcast %7 : vector<8x1xf32> to vector<8x32xf32>
    %9 = arith.subf %1, %8 : vector<8x32xf32>
    %10 = arith.mulf %9, %9 : vector<8x32xf32>
    %cst_7 = arith.constant dense<0.000000e+00> : vector<8xf32>
    %11 = vector.multi_reduction <add>, %10, %cst_7 [1] : vector<8x32xf32> to vector<8xf32>
    %12 = vector.shape_cast %11 : vector<8xf32> to vector<8x1xf32>
    %cst_8 = arith.constant 3.200000e+01 : f32
    %13 = vector.broadcast %cst_8 : f32 to vector<8x1xf32>
    %14 = arith.divf %12, %13 : vector<8x1xf32>
    %15 = vector.broadcast %7 : vector<8x1xf32> to vector<8x32xf32>
    %16 = arith.subf %1, %15 : vector<8x32xf32>
    %cst_9 = arith.constant 9.99999974E-6 : f32
    %17 = vector.broadcast %cst_9 : f32 to vector<8x1xf32>
    %18 = arith.addf %14, %17 : vector<8x1xf32>
    %19 = math.rsqrt %18 : vector<8x1xf32>
    %20 = vector.broadcast %19 : vector<8x1xf32> to vector<8x32xf32>
    %21 = arith.mulf %16, %20 : vector<8x32xf32>
    %22 = vector.broadcast %2 : vector<1x32xf32> to vector<8x32xf32>
    %23 = arith.mulf %21, %22 : vector<8x32xf32>
    %24 = vector.broadcast %3 : vector<1x32xf32> to vector<8x32xf32>
    %25 = arith.addf %23, %24 : vector<8x32xf32>
    %26 = arith.truncf %25 : vector<8x32xf32> to vector<8x32xbf16>
    %c0_10 = arith.constant 0 : index
    %c0_11 = arith.constant 0 : index
    %27 = vector.load %arg5[%c0_10, %c0_11] : memref<32x96xbf16, #tpu.memory_space<vmem>>, vector<32x96xbf16>
    %cst_12 = arith.constant dense<0.000000e+00> : vector<8x96xf32>
    %28 = tpu.matmul %26, %27, %cst_12 {dimension_numbers = #tpu.dot_dimension_numbers<[1], [0], [0], [1], [0, 0, 1, 1], [], []>} : vector<8x32xbf16>, vector<32x96xbf16>, vector<8x96xf32> -> vector<8x96xf32>
    %c0_13 = arith.constant 0 : index
    %c0_14 = arith.constant 0 : index
    %29 = vector.load %arg6[%c0_13, %c0_14] : memref<1x96xf32, #tpu.memory_space<vmem>>, vector<1x96xf32>
    %30 = vector.broadcast %29 : vector<1x96xf32> to vector<8x96xf32>
    %31 = arith.addf %28, %30 : vector<8x96xf32>
    %32 = arith.truncf %31 : vector<8x96xf32> to vector<8x96xbf16>
    %c0_15 = arith.constant 0 : index
    %c0_16 = arith.constant 0 : index
    %c0_17 = arith.constant 0 : index
    %33 = vector.load %arg7[%c0_15, %c0_16, %c0_17] : memref<1x8x96xbf16, #tpu.memory_space<vmem>>, vector<1x8x96xbf16>
    %34 = vector.shape_cast %33 : vector<1x8x96xbf16> to vector<8x96xbf16>
    %35 = vector.shape_cast %32 : vector<8x96xbf16> to vector<1x8x96xbf16>
    tpu.vector_store %arg7[%c0_15, %c0_16, %c0_17], %35 {strides = array<i32>} : memref<1x8x96xbf16, #tpu.memory_space<vmem>>, vector<1x8x96xbf16>,
    return
  }
  func.func @transform_0(%arg0: i32, %arg1: i32) -> (i32, i32, i32) {
    %c0_i32 = arith.constant 0 : i32
    %c0_i32_0 = arith.constant 0 : i32
    return %arg0, %arg1, %c0_i32 : i32, i32, i32
  }
  func.func @transform_1(%arg0: i32, %arg1: i32) -> (i32, i32) {
    %c0_i32 = arith.constant 0 : i32
    %c0_i32_0 = arith.constant 0 : i32
    %c0_i32_1 = arith.constant 0 : i32
    return %c0_i32, %c0_i32_0 : i32, i32
  }
  func.func @transform_2(%arg0: i32, %arg1: i32) -> (i32, i32) {
    %c0_i32 = arith.constant 0 : i32
    %c0_i32_0 = arith.constant 0 : i32
    %c0_i32_1 = arith.constant 0 : i32
    return %c0_i32, %c0_i32_0 : i32, i32
  }
  func.func @transform_3(%arg0: i32, %arg1: i32) -> (i32, i32) {
    %c0_i32 = arith.constant 0 : i32
    %c0_i32_0 = arith.constant 0 : i32
    %c0_i32_1 = arith.constant 0 : i32
    return %c0_i32, %c0_i32_0 : i32, i32
  }
  func.func @transform_4(%arg0: i32, %arg1: i32) -> (i32, i32) {
    %c0_i32 = arith.constant 0 : i32
    %c0_i32_0 = arith.constant 0 : i32
    %c0_i32_1 = arith.constant 0 : i32
    return %c0_i32, %c0_i32_0 : i32, i32
  }
  func.func @transform_5(%arg0: i32, %arg1: i32) -> (i32, i32, i32) {
    %c0_i32 = arith.constant 0 : i32
    %c0_i32_0 = arith.constant 0 : i32
    return %arg0, %arg1, %c0_i32 : i32, i32, i32
  }
}

module attributes {stable_mosaic.version = 11 : i64} {
  func.func @kernel(%arg0: i32, %arg1: i32, %arg2: i32, %arg3: memref<1x4x8x8xbf16, #tpu.memory_space<vmem>>, %arg4: memref<1x4x8x8xbf16, #tpu.memory_space<vmem>>, %arg5: memref<1x4x8x8xbf16, #tpu.memory_space<vmem>>, %arg6: memref<1x4x8x8xbf16, #tpu.memory_space<vmem>>, %arg7: memref<4x8x1xf32, #tpu.memory_space<vmem>>, %arg8: memref<4x8x1xf32, #tpu.memory_space<vmem>>, %arg9: memref<4x8x8xf32, #tpu.memory_space<vmem>>) attributes {dimension_semantics = [#tpu.dimension_semantics<parallel>, #tpu.dimension_semantics<parallel>, #tpu.dimension_semantics<arbitrary>], iteration_bounds = array<i64: 2, 1, 1>, scalar_prefetch = 0 : i64, scratch_operands = 3 : i64, tpu.core_type = #tpu.core_type<tc>, window_params = [{transform_indices = @transform_0, window_bounds = array<i64: 1, 4, 8, 8>}, {transform_indices = @transform_1, window_bounds = array<i64: 1, 4, 8, 8>}, {transform_indices = @transform_2, window_bounds = array<i64: 1, 4, 8, 8>}, {transform_indices = @transform_3, window_bounds = array<i64: 1, 4, 8, 8>}]} {
    %c0_i32 = arith.constant 0 : i32
    %0 = arith.cmpi eq, %arg2, %c0_i32 : i32
    %1 = arith.extui %0 : i1 to i32
    %c0_i32_0 = arith.constant 0 : i32
    %2 = arith.cmpi ne, %1, %c0_i32_0 : i32
    scf.if %2 {
      %cst = arith.constant -1.000000e+30 : f32
      %12 = vector.broadcast %cst : f32 to vector<4x8x1xf32>
      %c0 = arith.constant 0 : index
      %c0_5 = arith.constant 0 : index
      %c0_6 = arith.constant 0 : index
      %13 = vector.load %arg7[%c0, %c0_5, %c0_6] : memref<4x8x1xf32, #tpu.memory_space<vmem>>, vector<4x8x1xf32>
      tpu.vector_store %arg7[%c0, %c0_5, %c0_6], %12 {strides = array<i32>} : memref<4x8x1xf32, #tpu.memory_space<vmem>>, vector<4x8x1xf32>,
      %cst_7 = arith.constant 0.000000e+00 : f32
      %14 = vector.broadcast %cst_7 : f32 to vector<4x8x1xf32>
      %c0_8 = arith.constant 0 : index
      %c0_9 = arith.constant 0 : index
      %c0_10 = arith.constant 0 : index
      %15 = vector.load %arg8[%c0_8, %c0_9, %c0_10] : memref<4x8x1xf32, #tpu.memory_space<vmem>>, vector<4x8x1xf32>
      tpu.vector_store %arg8[%c0_8, %c0_9, %c0_10], %14 {strides = array<i32>} : memref<4x8x1xf32, #tpu.memory_space<vmem>>, vector<4x8x1xf32>,
      %cst_11 = arith.constant 0.000000e+00 : f32
      %16 = vector.broadcast %cst_11 : f32 to vector<4x8x8xf32>
      %c0_12 = arith.constant 0 : index
      %c0_13 = arith.constant 0 : index
      %c0_14 = arith.constant 0 : index
      %17 = vector.load %arg9[%c0_12, %c0_13, %c0_14] : memref<4x8x8xf32, #tpu.memory_space<vmem>>, vector<4x8x8xf32>
      tpu.vector_store %arg9[%c0_12, %c0_13, %c0_14], %16 {strides = array<i32>} : memref<4x8x8xf32, #tpu.memory_space<vmem>>, vector<4x8x8xf32>,
    } else {
    }
    %c8_i32 = arith.constant 8 : i32
    %3 = arith.muli %arg1, %c8_i32 : i32
    %c8_i32_1 = arith.constant 8 : i32
    %4 = arith.muli %arg2, %c8_i32_1 : i32
    %c7_i32 = arith.constant 7 : i32
    %5 = arith.addi %3, %c7_i32 : i32
    %6 = arith.cmpi sle, %4, %5 : i32
    %7 = arith.extui %6 : i1 to i32
    %c0_i32_2 = arith.constant 0 : i32
    %8 = arith.cmpi ne, %7, %c0_i32_2 : i32
    scf.if %8 {
      %c0 = arith.constant 0 : index
      %c0_5 = arith.constant 0 : index
      %c0_6 = arith.constant 0 : index
      %c0_7 = arith.constant 0 : index
      %12 = vector.load %arg3[%c0, %c0_5, %c0_6, %c0_7] : memref<1x4x8x8xbf16, #tpu.memory_space<vmem>>, vector<1x4x8x8xbf16>
      %13 = vector.shape_cast %12 : vector<1x4x8x8xbf16> to vector<4x8x8xbf16>
      %c0_8 = arith.constant 0 : index
      %c0_9 = arith.constant 0 : index
      %c0_10 = arith.constant 0 : index
      %c0_11 = arith.constant 0 : index
      %14 = vector.load %arg4[%c0_8, %c0_9, %c0_10, %c0_11] : memref<1x4x8x8xbf16, #tpu.memory_space<vmem>>, vector<1x4x8x8xbf16>
      %15 = vector.shape_cast %14 : vector<1x4x8x8xbf16> to vector<4x8x8xbf16>
      "tpu.trace_start"() <{level = 10 : i32, message = "hqd,hkd->hqk"}> : () -> ()
      %cst = arith.constant dense<0.000000e+00> : vector<4x8x8xf32>
      %16 = tpu.matmul %13, %15, %cst {dimension_numbers = #tpu.dot_dimension_numbers<[2], [2], [1], [1], [0, 0, 0, 1, 1, 1], [0], [0]>} : vector<4x8x8xbf16>, vector<4x8x8xbf16>, vector<4x8x8xf32> -> vector<4x8x8xf32>
      "tpu.trace_stop"() : () -> ()
      %cst_12 = arith.constant 0.353553385 : f32
      %17 = vector.broadcast %cst_12 : f32 to vector<4x8x8xf32>
      %18 = arith.mulf %16, %17 : vector<4x8x8xf32>
      %19 = tpu.iota {dimensions = array<i32: 0>} : vector<8x8xi32>
      %20 = vector.broadcast %3 : i32 to vector<8x8xi32>
      %21 = arith.addi %20, %19 : vector<8x8xi32>
      %22 = tpu.iota {dimensions = array<i32: 1>} : vector<8x8xi32>
      %23 = vector.broadcast %4 : i32 to vector<8x8xi32>
      %24 = arith.addi %23, %22 : vector<8x8xi32>
      %25 = arith.cmpi sle, %24, %21 : vector<8x8xi32>
      %26 = vector.shape_cast %25 : vector<8x8xi1> to vector<1x8x8xi1>
      %cst_13 = arith.constant -1.000000e+04 : f32
      %27 = vector.shape_cast %26 : vector<1x8x8xi1> to vector<1x8x8xi1>
      %28 = vector.broadcast %27 : vector<1x8x8xi1> to vector<4x8x8xi1>
      %29 = vector.broadcast %cst_13 : f32 to vector<4x8x8xf32>
      %30 = arith.select %28, %18, %29 : vector<4x8x8xi1>, vector<4x8x8xf32>
      %c0_14 = arith.constant 0 : index
      %c0_15 = arith.constant 0 : index
      %c0_16 = arith.constant 0 : index
      %31 = vector.load %arg7[%c0_14, %c0_15, %c0_16] : memref<4x8x1xf32, #tpu.memory_space<vmem>>, vector<4x8x1xf32>
      %cst_17 = arith.constant dense<0xFF800000> : vector<4x8xf32>
      %32 = vector.multi_reduction <maximumf>, %30, %cst_17 [2] : vector<4x8x8xf32> to vector<4x8xf32>
      %33 = vector.shape_cast %32 : vector<4x8xf32> to vector<4x8x1xf32>
      %34 = arith.maximumf %31, %33 : vector<4x8x1xf32>
      %35 = arith.subf %31, %34 : vector<4x8x1xf32>
      %36 = math.exp %35 : vector<4x8x1xf32>
      %37 = vector.broadcast %34 : vector<4x8x1xf32> to vector<4x8x8xf32>
      %38 = arith.subf %30, %37 : vector<4x8x8xf32>
      %39 = math.exp %38 : vector<4x8x8xf32>
      %c0_18 = arith.constant 0 : index
      %c0_19 = arith.constant 0 : index
      %c0_20 = arith.constant 0 : index
      %40 = vector.load %arg8[%c0_18, %c0_19, %c0_20] : memref<4x8x1xf32, #tpu.memory_space<vmem>>, vector<4x8x1xf32>
      %41 = arith.mulf %36, %40 : vector<4x8x1xf32>
      %cst_21 = arith.constant dense<0.000000e+00> : vector<4x8xf32>
      %42 = vector.multi_reduction <add>, %39, %cst_21 [2] : vector<4x8x8xf32> to vector<4x8xf32>
      %43 = vector.shape_cast %42 : vector<4x8xf32> to vector<4x8x1xf32>
      %44 = arith.addf %41, %43 : vector<4x8x1xf32>
      %c0_22 = arith.constant 0 : index
      %c0_23 = arith.constant 0 : index
      %c0_24 = arith.constant 0 : index
      %45 = vector.load %arg8[%c0_22, %c0_23, %c0_24] : memref<4x8x1xf32, #tpu.memory_space<vmem>>, vector<4x8x1xf32>
      tpu.vector_store %arg8[%c0_22, %c0_23, %c0_24], %44 {strides = array<i32>} : memref<4x8x1xf32, #tpu.memory_space<vmem>>, vector<4x8x1xf32>,
      %c0_25 = arith.constant 0 : index
      %c0_26 = arith.constant 0 : index
      %c0_27 = arith.constant 0 : index
      %46 = vector.load %arg9[%c0_25, %c0_26, %c0_27] : memref<4x8x8xf32, #tpu.memory_space<vmem>>, vector<4x8x8xf32>
      %47 = vector.broadcast %36 : vector<4x8x1xf32> to vector<4x8x8xf32>
      %48 = arith.mulf %47, %46 : vector<4x8x8xf32>
      %49 = arith.truncf %39 : vector<4x8x8xf32> to vector<4x8x8xbf16>
      %c0_28 = arith.constant 0 : index
      %c0_29 = arith.constant 0 : index
      %c0_30 = arith.constant 0 : index
      %c0_31 = arith.constant 0 : index
      %50 = vector.load %arg5[%c0_28, %c0_29, %c0_30, %c0_31] : memref<1x4x8x8xbf16, #tpu.memory_space<vmem>>, vector<1x4x8x8xbf16>
      %51 = vector.shape_cast %50 : vector<1x4x8x8xbf16> to vector<4x8x8xbf16>
      "tpu.trace_start"() <{level = 10 : i32, message = "hqk,hkd->hqd"}> : () -> ()
      %cst_32 = arith.constant dense<0.000000e+00> : vector<4x8x8xf32>
      %52 = tpu.matmul %49, %51, %cst_32 {dimension_numbers = #tpu.dot_dimension_numbers<[2], [1], [1], [2], [0, 0, 0, 1, 1, 2], [0], [0]>} : vector<4x8x8xbf16>, vector<4x8x8xbf16>, vector<4x8x8xf32> -> vector<4x8x8xf32>
      "tpu.trace_stop"() : () -> ()
      %53 = arith.addf %48, %52 : vector<4x8x8xf32>
      %c0_33 = arith.constant 0 : index
      %c0_34 = arith.constant 0 : index
      %c0_35 = arith.constant 0 : index
      %54 = vector.load %arg9[%c0_33, %c0_34, %c0_35] : memref<4x8x8xf32, #tpu.memory_space<vmem>>, vector<4x8x8xf32>
      tpu.vector_store %arg9[%c0_33, %c0_34, %c0_35], %53 {strides = array<i32>} : memref<4x8x8xf32, #tpu.memory_space<vmem>>, vector<4x8x8xf32>,
      %c0_36 = arith.constant 0 : index
      %c0_37 = arith.constant 0 : index
      %c0_38 = arith.constant 0 : index
      %55 = vector.load %arg7[%c0_36, %c0_37, %c0_38] : memref<4x8x1xf32, #tpu.memory_space<vmem>>, vector<4x8x1xf32>
      tpu.vector_store %arg7[%c0_36, %c0_37, %c0_38], %34 {strides = array<i32>} : memref<4x8x1xf32, #tpu.memory_space<vmem>>, vector<4x8x1xf32>,
    } else {
    }
    %c0_i32_3 = arith.constant 0 : i32
    %9 = arith.cmpi eq, %arg2, %c0_i32_3 : i32
    %10 = arith.extui %9 : i1 to i32
    %c0_i32_4 = arith.constant 0 : i32
    %11 = arith.cmpi ne, %10, %c0_i32_4 : i32
    scf.if %11 {
      %c0 = arith.constant 0 : index
      %c0_5 = arith.constant 0 : index
      %c0_6 = arith.constant 0 : index
      %12 = vector.load %arg9[%c0, %c0_5, %c0_6] : memref<4x8x8xf32, #tpu.memory_space<vmem>>, vector<4x8x8xf32>
      %c0_7 = arith.constant 0 : index
      %c0_8 = arith.constant 0 : index
      %c0_9 = arith.constant 0 : index
      %13 = vector.load %arg8[%c0_7, %c0_8, %c0_9] : memref<4x8x1xf32, #tpu.memory_space<vmem>>, vector<4x8x1xf32>
      %14 = tpu.reciprocal %13 {approx = true} : vector<4x8x1xf32> -> vector<4x8x1xf32>
      %15 = vector.broadcast %14 : vector<4x8x1xf32> to vector<4x8x8xf32>
      %16 = arith.mulf %12, %15 : vector<4x8x8xf32>
      %17 = arith.truncf %16 : vector<4x8x8xf32> to vector<4x8x8xbf16>
      %c0_10 = arith.constant 0 : index
      %c0_11 = arith.constant 0 : index
      %c0_12 = arith.constant 0 : index
      %c0_13 = arith.constant 0 : index
      %18 = vector.load %arg6[%c0_10, %c0_11, %c0_12, %c0_13] : memref<1x4x8x8xbf16, #tpu.memory_space<vmem>>, vector<1x4x8x8xbf16>
      %19 = vector.shape_cast %18 : vector<1x4x8x8xbf16> to vector<4x8x8xbf16>
      %20 = vector.shape_cast %17 : vector<4x8x8xbf16> to vector<1x4x8x8xbf16>
      tpu.vector_store %arg6[%c0_10, %c0_11, %c0_12, %c0_13], %20 {strides = array<i32>} : memref<1x4x8x8xbf16, #tpu.memory_space<vmem>>, vector<1x4x8x8xbf16>,
    } else {
    }
    return
  }
  func.func @transform_0(%arg0: i32, %arg1: i32, %arg2: i32) -> (i32, i32, i32, i32) {
    %c0_i32 = arith.constant 0 : i32
    %c0_i32_0 = arith.constant 0 : i32
    %c0_i32_1 = arith.constant 0 : i32
    return %arg0, %c0_i32, %arg1, %c0_i32_0 : i32, i32, i32, i32
  }
  func.func @transform_1(%arg0: i32, %arg1: i32, %arg2: i32) -> (i32, i32, i32, i32) {
    %c0_i32 = arith.constant 0 : i32
    %c0_i32_0 = arith.constant 0 : i32
    %c0_i32_1 = arith.constant 0 : i32
    return %arg0, %c0_i32, %arg2, %c0_i32_0 : i32, i32, i32, i32
  }
  func.func @transform_2(%arg0: i32, %arg1: i32, %arg2: i32) -> (i32, i32, i32, i32) {
    %c0_i32 = arith.constant 0 : i32
    %c0_i32_0 = arith.constant 0 : i32
    %c0_i32_1 = arith.constant 0 : i32
    return %arg0, %c0_i32, %arg2, %c0_i32_0 : i32, i32, i32, i32
  }
  func.func @transform_3(%arg0: i32, %arg1: i32, %arg2: i32) -> (i32, i32, i32, i32) {
    %c0_i32 = arith.constant 0 : i32
    %c0_i32_0 = arith.constant 0 : i32
    %c0_i32_1 = arith.constant 0 : i32
    return %arg0, %c0_i32, %arg1, %c0_i32_0 : i32, i32, i32, i32
  }
}

module attributes {stable_mosaic.version = 11 : i64} {
  func.func @kernel(%arg0: i32, %arg1: i32, %arg2: memref<1x8x32xbf16, #tpu.memory_space<vmem>>, %arg3: memref<1x8x32xf32, #tpu.memory_space<vmem>>, %arg4: memref<32x32xbf16, #tpu.memory_space<vmem>>, %arg5: memref<1x32xf32, #tpu.memory_space<vmem>>, %arg6: memref<1x32xf32, #tpu.memory_space<vmem>>, %arg7: memref<1x32xf32, #tpu.memory_space<vmem>>, %arg8: memref<32x128xbf16, #tpu.memory_space<vmem>>, %arg9: memref<1x128xf32, #tpu.memory_space<vmem>>, %arg10: memref<128x32xbf16, #tpu.memory_space<vmem>>, %arg11: memref<1x32xf32, #tpu.memory_space<vmem>>, %arg12: memref<1x8x32xf32, #tpu.memory_space<vmem>>) attributes {dimension_semantics = [#tpu.dimension_semantics<parallel>, #tpu.dimension_semantics<parallel>], iteration_bounds = array<i64: 2, 1>, scalar_prefetch = 0 : i64, scratch_operands = 0 : i64, tpu.core_type = #tpu.core_type<tc>, window_params = [{transform_indices = @transform_0, window_bounds = array<i64: 1, 8, 32>}, {transform_indices = @transform_1, window_bounds = array<i64: 1, 8, 32>}, {pipeline_mode = #tpu.pipeline_mode<synchronous>, transform_indices = @transform_2, window_bounds = array<i64: 32, 32>}, {pipeline_mode = #tpu.pipeline_mode<synchronous>, transform_indices = @transform_3, window_bounds = array<i64: 1, 32>}, {pipeline_mode = #tpu.pipeline_mode<synchronous>, transform_indices = @transform_4, window_bounds = array<i64: 1, 32>}, {pipeline_mode = #tpu.pipeline_mode<synchronous>, transform_indices = @transform_5, window_bounds = array<i64: 1, 32>}, {pipeline_mode = #tpu.pipeline_mode<synchronous>, transform_indices = @transform_6, window_bounds = array<i64: 32, 128>}, {pipeline_mode = #tpu.pipeline_mode<synchronous>, transform_indices = @transform_7, window_bounds = array<i64: 1, 128>}, {pipeline_mode = #tpu.pipeline_mode<synchronous>, transform_indices = @transform_8, window_bounds = array<i64: 128, 32>}, {pipeline_mode = #tpu.pipeline_mode<synchronous>, transform_indices = @transform_9, window_bounds = array<i64: 1, 32>}, {transform_indices = @transform_10, window_bounds = array<i64: 1, 8, 32>}]} {
    %c0 = arith.constant 0 : index
    %c0_0 = arith.constant 0 : index
    %c0_1 = arith.constant 0 : index
    %0 = vector.load %arg2[%c0, %c0_0, %c0_1] : memref<1x8x32xbf16, #tpu.memory_space<vmem>>, vector<1x8x32xbf16>
    %1 = vector.shape_cast %0 : vector<1x8x32xbf16> to vector<8x32xbf16>
    %c0_2 = arith.constant 0 : index
    %c0_3 = arith.constant 0 : index
    %2 = vector.load %arg4[%c0_2, %c0_3] : memref<32x32xbf16, #tpu.memory_space<vmem>>, vector<32x32xbf16>
    %cst = arith.constant dense<0.000000e+00> : vector<8x32xf32>
    %3 = tpu.matmul %1, %2, %cst {dimension_numbers = #tpu.dot_dimension_numbers<[1], [0], [0], [1], [0, 0, 1, 1], [], []>} : vector<8x32xbf16>, vector<32x32xbf16>, vector<8x32xf32> -> vector<8x32xf32>
    %c0_4 = arith.constant 0 : index
    %c0_5 = arith.constant 0 : index
    %4 = vector.load %arg5[%c0_4, %c0_5] : memref<1x32xf32, #tpu.memory_space<vmem>>, vector<1x32xf32>
    %5 = vector.broadcast %4 : vector<1x32xf32> to vector<8x32xf32>
    %6 = arith.addf %3, %5 : vector<8x32xf32>
    %c0_6 = arith.constant 0 : index
    %c0_7 = arith.constant 0 : index
    %c0_8 = arith.constant 0 : index
    %7 = vector.load %arg3[%c0_6, %c0_7, %c0_8] : memref<1x8x32xf32, #tpu.memory_space<vmem>>, vector<1x8x32xf32>
    %8 = vector.shape_cast %7 : vector<1x8x32xf32> to vector<8x32xf32>
    %9 = arith.addf %8, %6 : vector<8x32xf32>
    %c0_9 = arith.constant 0 : index
    %c0_10 = arith.constant 0 : index
    %10 = vector.load %arg6[%c0_9, %c0_10] : memref<1x32xf32, #tpu.memory_space<vmem>>, vector<1x32xf32>
    %c0_11 = arith.constant 0 : index
    %c0_12 = arith.constant 0 : index
    %11 = vector.load %arg7[%c0_11, %c0_12] : memref<1x32xf32, #tpu.memory_space<vmem>>, vector<1x32xf32>
    %cst_13 = arith.constant dense<0.000000e+00> : vector<8xf32>
    %12 = vector.multi_reduction <add>, %9, %cst_13 [1] : vector<8x32xf32> to vector<8xf32>
    %13 = vector.shape_cast %12 : vector<8xf32> to vector<8x1xf32>
    %cst_14 = arith.constant 3.200000e+01 : f32
    %14 = vector.broadcast %cst_14 : f32 to vector<8x1xf32>
    %15 = arith.divf %13, %14 : vector<8x1xf32>
    %16 = vector.broadcast %15 : vector<8x1xf32> to vector<8x32xf32>
    %17 = arith.subf %9, %16 : vector<8x32xf32>
    %18 = arith.mulf %17, %17 : vector<8x32xf32>
    %cst_15 = arith.constant dense<0.000000e+00> : vector<8xf32>
    %19 = vector.multi_reduction <add>, %18, %cst_15 [1] : vector<8x32xf32> to vector<8xf32>
    %20 = vector.shape_cast %19 : vector<8xf32> to vector<8x1xf32>
    %cst_16 = arith.constant 3.200000e+01 : f32
    %21 = vector.broadcast %cst_16 : f32 to vector<8x1xf32>
    %22 = arith.divf %20, %21 : vector<8x1xf32>
    %23 = vector.broadcast %15 : vector<8x1xf32> to vector<8x32xf32>
    %24 = arith.subf %9, %23 : vector<8x32xf32>
    %cst_17 = arith.constant 9.99999974E-6 : f32
    %25 = vector.broadcast %cst_17 : f32 to vector<8x1xf32>
    %26 = arith.addf %22, %25 : vector<8x1xf32>
    %27 = math.rsqrt %26 : vector<8x1xf32>
    %28 = vector.broadcast %27 : vector<8x1xf32> to vector<8x32xf32>
    %29 = arith.mulf %24, %28 : vector<8x32xf32>
    %30 = vector.broadcast %10 : vector<1x32xf32> to vector<8x32xf32>
    %31 = arith.mulf %29, %30 : vector<8x32xf32>
    %32 = vector.broadcast %11 : vector<1x32xf32> to vector<8x32xf32>
    %33 = arith.addf %31, %32 : vector<8x32xf32>
    %34 = arith.truncf %33 : vector<8x32xf32> to vector<8x32xbf16>
    %c0_18 = arith.constant 0 : index
    %c0_19 = arith.constant 0 : index
    %35 = vector.load %arg8[%c0_18, %c0_19] : memref<32x128xbf16, #tpu.memory_space<vmem>>, vector<32x128xbf16>
    %cst_20 = arith.constant dense<0.000000e+00> : vector<8x128xf32>
    %36 = tpu.matmul %34, %35, %cst_20 {dimension_numbers = #tpu.dot_dimension_numbers<[1], [0], [0], [1], [0, 0, 1, 1], [], []>} : vector<8x32xbf16>, vector<32x128xbf16>, vector<8x128xf32> -> vector<8x128xf32>
    %c0_21 = arith.constant 0 : index
    %c0_22 = arith.constant 0 : index
    %37 = vector.load %arg9[%c0_21, %c0_22] : memref<1x128xf32, #tpu.memory_space<vmem>>, vector<1x128xf32>
    %38 = vector.broadcast %37 : vector<1x128xf32> to vector<8x128xf32>
    %39 = arith.addf %36, %38 : vector<8x128xf32>
    %cst_23 = arith.constant 0.000000e+00 : f32
    %40 = vector.broadcast %cst_23 : f32 to vector<8x128xf32>
    %41 = arith.maximumf %39, %40 : vector<8x128xf32>
    %42 = arith.truncf %41 : vector<8x128xf32> to vector<8x128xbf16>
    %c0_24 = arith.constant 0 : index
    %c0_25 = arith.constant 0 : index
    %43 = vector.load %arg10[%c0_24, %c0_25] : memref<128x32xbf16, #tpu.memory_space<vmem>>, vector<128x32xbf16>
    %cst_26 = arith.constant dense<0.000000e+00> : vector<8x32xf32>
    %44 = tpu.matmul %42, %43, %cst_26 {dimension_numbers = #tpu.dot_dimension_numbers<[1], [0], [0], [1], [0, 0, 1, 1], [], []>} : vector<8x128xbf16>, vector<128x32xbf16>, vector<8x32xf32> -> vector<8x32xf32>
    %c0_27 = arith.constant 0 : index
    %c0_28 = arith.constant 0 : index
    %45 = vector.load %arg11[%c0_27, %c0_28] : memref<1x32xf32, #tpu.memory_space<vmem>>, vector<1x32xf32>
    %46 = vector.broadcast %45 : vector<1x32xf32> to vector<8x32xf32>
    %47 = arith.addf %44, %46 : vector<8x32xf32>
    %48 = arith.addf %9, %47 : vector<8x32xf32>
    %c0_29 = arith.constant 0 : index
    %c0_30 = arith.constant 0 : index
    %c0_31 = arith.constant 0 : index
    %49 = vector.load %arg12[%c0_29, %c0_30, %c0_31] : memref<1x8x32xf32, #tpu.memory_space<vmem>>, vector<1x8x32xf32>
    %50 = vector.shape_cast %49 : vector<1x8x32xf32> to vector<8x32xf32>
    %51 = vector.shape_cast %48 : vector<8x32xf32> to vector<1x8x32xf32>
    tpu.vector_store %arg12[%c0_29, %c0_30, %c0_31], %51 {strides = array<i32>} : memref<1x8x32xf32, #tpu.memory_space<vmem>>, vector<1x8x32xf32>,
    return
  }
  func.func @transform_0(%arg0: i32, %arg1: i32) -> (i32, i32, i32) {
    %c0_i32 = arith.constant 0 : i32
    %c0_i32_0 = arith.constant 0 : i32
    return %arg0, %arg1, %c0_i32 : i32, i32, i32
  }
  func.func @transform_1(%arg0: i32, %arg1: i32) -> (i32, i32, i32) {
    %c0_i32 = arith.constant 0 : i32
    %c0_i32_0 = arith.constant 0 : i32
    return %arg0, %arg1, %c0_i32 : i32, i32, i32
  }
  func.func @transform_2(%arg0: i32, %arg1: i32) -> (i32, i32) {
    %c0_i32 = arith.constant 0 : i32
    %c0_i32_0 = arith.constant 0 : i32
    %c0_i32_1 = arith.constant 0 : i32
    return %c0_i32, %c0_i32_0 : i32, i32
  }
  func.func @transform_3(%arg0: i32, %arg1: i32) -> (i32, i32) {
    %c0_i32 = arith.constant 0 : i32
    %c0_i32_0 = arith.constant 0 : i32
    %c0_i32_1 = arith.constant 0 : i32
    return %c0_i32, %c0_i32_0 : i32, i32
  }
  func.func @transform_4(%arg0: i32, %arg1: i32) -> (i32, i32) {
    %c0_i32 = arith.constant 0 : i32
    %c0_i32_0 = arith.constant 0 : i32
    %c0_i32_1 = arith.constant 0 : i32
    return %c0_i32, %c0_i32_0 : i32, i32
  }
  func.func @transform_5(%arg0: i32, %arg1: i32) -> (i32, i32) {
    %c0_i32 = arith.constant 0 : i32
    %c0_i32_0 = arith.constant 0 : i32
    %c0_i32_1 = arith.constant 0 : i32
    return %c0_i32, %c0_i32_0 : i32, i32
  }
  func.func @transform_6(%arg0: i32, %arg1: i32) -> (i32, i32) {
    %c0_i32 = arith.constant 0 : i32
    %c0_i32_0 = arith.constant 0 : i32
    %c0_i32_1 = arith.constant 0 : i32
    return %c0_i32, %c0_i32_0 : i32, i32
  }
  func.func @transform_7(%arg0: i32, %arg1: i32) -> (i32, i32) {
    %c0_i32 = arith.constant 0 : i32
    %c0_i32_0 = arith.constant 0 : i32
    %c0_i32_1 = arith.constant 0 : i32
    return %c0_i32, %c0_i32_0 : i32, i32
  }
  func.func @transform_8(%arg0: i32, %arg1: i32) -> (i32, i32) {
    %c0_i32 = arith.constant 0 : i32
    %c0_i32_0 = arith.constant 0 : i32
    %c0_i32_1 = arith.constant 0 : i32
    return %c0_i32, %c0_i32_0 : i32, i32
  }
  func.func @transform_9(%arg0: i32, %arg1: i32) -> (i32, i32) {
    %c0_i32 = arith.constant 0 : i32
    %c0_i32_0 = arith.constant 0 : i32
    %c0_i32_1 = arith.constant 0 : i32
    return %c0_i32, %c0_i32_0 : i32, i32
  }
  func.func @transform_10(%arg0: i32, %arg1: i32) -> (i32, i32, i32) {
    %c0_i32 = arith.constant 0 : i32
    %c0_i32_0 = arith.constant 0 : i32
    return %arg0, %arg1, %c0_i32 : i32, i32, i32
  }
}

module attributes {stable_mosaic.version = 11 : i64} {
  func.func @kernel(%arg0: i32, %arg1: i32, %arg2: memref<1x8x32xbf16, #tpu.memory_space<vmem>>, %arg3: memref<1x8x32xf32, #tpu.memory_space<vmem>>, %arg4: memref<32x32xbf16, #tpu.memory_space<vmem>>, %arg5: memref<1x32xf32, #tpu.memory_space<vmem>>, %arg6: memref<1x32xf32, #tpu.memory_space<vmem>>, %arg7: memref<1x32xf32, #tpu.memory_space<vmem>>, %arg8: memref<32x128xbf16, #tpu.memory_space<vmem>>, %arg9: memref<1x128xf32, #tpu.memory_space<vmem>>, %arg10: memref<128x32xbf16, #tpu.memory_space<vmem>>, %arg11: memref<1x32xf32, #tpu.memory_space<vmem>>, %arg12: memref<1x32xf32, #tpu.memory_space<vmem>>, %arg13: memref<1x32xf32, #tpu.memory_space<vmem>>, %arg14: memref<1x8x32xf32, #tpu.memory_space<vmem>>) attributes {dimension_semantics = [#tpu.dimension_semantics<parallel>, #tpu.dimension_semantics<parallel>], iteration_bounds = array<i64: 2, 1>, scalar_prefetch = 0 : i64, scratch_operands = 0 : i64, tpu.core_type = #tpu.core_type<tc>, window_params = [{transform_indices = @transform_0, window_bounds = array<i64: 1, 8, 32>}, {transform_indices = @transform_1, window_bounds = array<i64: 1, 8, 32>}, {pipeline_mode = #tpu.pipeline_mode<synchronous>, transform_indices = @transform_2, window_bounds = array<i64: 32, 32>}, {pipeline_mode = #tpu.pipeline_mode<synchronous>, transform_indices = @transform_3, window_bounds = array<i64: 1, 32>}, {pipeline_mode = #tpu.pipeline_mode<synchronous>, transform_indices = @transform_4, window_bounds = array<i64: 1, 32>}, {pipeline_mode = #tpu.pipeline_mode<synchronous>, transform_indices = @transform_5, window_bounds = array<i64: 1, 32>}, {pipeline_mode = #tpu.pipeline_mode<synchronous>, transform_indices = @transform_6, window_bounds = array<i64: 32, 128>}, {pipeline_mode = #tpu.pipeline_mode<synchronous>, transform_indices = @transform_7, window_bounds = array<i64: 1, 128>}, {pipeline_mode = #tpu.pipeline_mode<synchronous>, transform_indices = @transform_8, window_bounds = array<i64: 128, 32>}, {pipeline_mode = #tpu.pipeline_mode<synchronous>, transform_indices = @transform_9, window_bounds = array<i64: 1, 32>}, {pipeline_mode = #tpu.pipeline_mode<synchronous>, transform_indices = @transform_10, window_bounds = array<i64: 1, 32>}, {pipeline_mode = #tpu.pipeline_mode<synchronous>, transform_indices = @transform_11, window_bounds = array<i64: 1, 32>}, {transform_indices = @transform_12, window_bounds = array<i64: 1, 8, 32>}]} {
    %c0 = arith.constant 0 : index
    %c0_0 = arith.constant 0 : index
    %c0_1 = arith.constant 0 : index
    %0 = vector.load %arg2[%c0, %c0_0, %c0_1] : memref<1x8x32xbf16, #tpu.memory_space<vmem>>, vector<1x8x32xbf16>
    %1 = vector.shape_cast %0 : vector<1x8x32xbf16> to vector<8x32xbf16>
    %c0_2 = arith.constant 0 : index
    %c0_3 = arith.constant 0 : index
    %2 = vector.load %arg4[%c0_2, %c0_3] : memref<32x32xbf16, #tpu.memory_space<vmem>>, vector<32x32xbf16>
    %cst = arith.constant dense<0.000000e+00> : vector<8x32xf32>
    %3 = tpu.matmul %1, %2, %cst {dimension_numbers = #tpu.dot_dimension_numbers<[1], [0], [0], [1], [0, 0, 1, 1], [], []>} : vector<8x32xbf16>, vector<32x32xbf16>, vector<8x32xf32> -> vector<8x32xf32>
    %c0_4 = arith.constant 0 : index
    %c0_5 = arith.constant 0 : index
    %4 = vector.load %arg5[%c0_4, %c0_5] : memref<1x32xf32, #tpu.memory_space<vmem>>, vector<1x32xf32>
    %5 = vector.broadcast %4 : vector<1x32xf32> to vector<8x32xf32>
    %6 = arith.addf %3, %5 : vector<8x32xf32>
    %c0_6 = arith.constant 0 : index
    %c0_7 = arith.constant 0 : index
    %c0_8 = arith.constant 0 : index
    %7 = vector.load %arg3[%c0_6, %c0_7, %c0_8] : memref<1x8x32xf32, #tpu.memory_space<vmem>>, vector<1x8x32xf32>
    %8 = vector.shape_cast %7 : vector<1x8x32xf32> to vector<8x32xf32>
    %9 = arith.addf %8, %6 : vector<8x32xf32>
    %c0_9 = arith.constant 0 : index
    %c0_10 = arith.constant 0 : index
    %10 = vector.load %arg6[%c0_9, %c0_10] : memref<1x32xf32, #tpu.memory_space<vmem>>, vector<1x32xf32>
    %c0_11 = arith.constant 0 : index
    %c0_12 = arith.constant 0 : index
    %11 = vector.load %arg7[%c0_11, %c0_12] : memref<1x32xf32, #tpu.memory_space<vmem>>, vector<1x32xf32>
    %cst_13 = arith.constant dense<0.000000e+00> : vector<8xf32>
    %12 = vector.multi_reduction <add>, %9, %cst_13 [1] : vector<8x32xf32> to vector<8xf32>
    %13 = vector.shape_cast %12 : vector<8xf32> to vector<8x1xf32>
    %cst_14 = arith.constant 3.200000e+01 : f32
    %14 = vector.broadcast %cst_14 : f32 to vector<8x1xf32>
    %15 = arith.divf %13, %14 : vector<8x1xf32>
    %16 = vector.broadcast %15 : vector<8x1xf32> to vector<8x32xf32>
    %17 = arith.subf %9, %16 : vector<8x32xf32>
    %18 = arith.mulf %17, %17 : vector<8x32xf32>
    %cst_15 = arith.constant dense<0.000000e+00> : vector<8xf32>
    %19 = vector.multi_reduction <add>, %18, %cst_15 [1] : vector<8x32xf32> to vector<8xf32>
    %20 = vector.shape_cast %19 : vector<8xf32> to vector<8x1xf32>
    %cst_16 = arith.constant 3.200000e+01 : f32
    %21 = vector.broadcast %cst_16 : f32 to vector<8x1xf32>
    %22 = arith.divf %20, %21 : vector<8x1xf32>
    %23 = vector.broadcast %15 : vector<8x1xf32> to vector<8x32xf32>
    %24 = arith.subf %9, %23 : vector<8x32xf32>
    %cst_17 = arith.constant 9.99999974E-6 : f32
    %25 = vector.broadcast %cst_17 : f32 to vector<8x1xf32>
    %26 = arith.addf %22, %25 : vector<8x1xf32>
    %27 = math.rsqrt %26 : vector<8x1xf32>
    %28 = vector.broadcast %27 : vector<8x1xf32> to vector<8x32xf32>
    %29 = arith.mulf %24, %28 : vector<8x32xf32>
    %30 = vector.broadcast %10 : vector<1x32xf32> to vector<8x32xf32>
    %31 = arith.mulf %29, %30 : vector<8x32xf32>
    %32 = vector.broadcast %11 : vector<1x32xf32> to vector<8x32xf32>
    %33 = arith.addf %31, %32 : vector<8x32xf32>
    %34 = arith.truncf %33 : vector<8x32xf32> to vector<8x32xbf16>
    %c0_18 = arith.constant 0 : index
    %c0_19 = arith.constant 0 : index
    %35 = vector.load %arg8[%c0_18, %c0_19] : memref<32x128xbf16, #tpu.memory_space<vmem>>, vector<32x128xbf16>
    %cst_20 = arith.constant dense<0.000000e+00> : vector<8x128xf32>
    %36 = tpu.matmul %34, %35, %cst_20 {dimension_numbers = #tpu.dot_dimension_numbers<[1], [0], [0], [1], [0, 0, 1, 1], [], []>} : vector<8x32xbf16>, vector<32x128xbf16>, vector<8x128xf32> -> vector<8x128xf32>
    %c0_21 = arith.constant 0 : index
    %c0_22 = arith.constant 0 : index
    %37 = vector.load %arg9[%c0_21, %c0_22] : memref<1x128xf32, #tpu.memory_space<vmem>>, vector<1x128xf32>
    %38 = vector.broadcast %37 : vector<1x128xf32> to vector<8x128xf32>
    %39 = arith.addf %36, %38 : vector<8x128xf32>
    %cst_23 = arith.constant 0.000000e+00 : f32
    %40 = vector.broadcast %cst_23 : f32 to vector<8x128xf32>
    %41 = arith.maximumf %39, %40 : vector<8x128xf32>
    %42 = arith.truncf %41 : vector<8x128xf32> to vector<8x128xbf16>
    %c0_24 = arith.constant 0 : index
    %c0_25 = arith.constant 0 : index
    %43 = vector.load %arg10[%c0_24, %c0_25] : memref<128x32xbf16, #tpu.memory_space<vmem>>, vector<128x32xbf16>
    %cst_26 = arith.constant dense<0.000000e+00> : vector<8x32xf32>
    %44 = tpu.matmul %42, %43, %cst_26 {dimension_numbers = #tpu.dot_dimension_numbers<[1], [0], [0], [1], [0, 0, 1, 1], [], []>} : vector<8x128xbf16>, vector<128x32xbf16>, vector<8x32xf32> -> vector<8x32xf32>
    %c0_27 = arith.constant 0 : index
    %c0_28 = arith.constant 0 : index
    %45 = vector.load %arg11[%c0_27, %c0_28] : memref<1x32xf32, #tpu.memory_space<vmem>>, vector<1x32xf32>
    %46 = vector.broadcast %45 : vector<1x32xf32> to vector<8x32xf32>
    %47 = arith.addf %44, %46 : vector<8x32xf32>
    %48 = arith.addf %9, %47 : vector<8x32xf32>
    %c0_29 = arith.constant 0 : index
    %c0_30 = arith.constant 0 : index
    %49 = vector.load %arg12[%c0_29, %c0_30] : memref<1x32xf32, #tpu.memory_space<vmem>>, vector<1x32xf32>
    %c0_31 = arith.constant 0 : index
    %c0_32 = arith.constant 0 : index
    %50 = vector.load %arg13[%c0_31, %c0_32] : memref<1x32xf32, #tpu.memory_space<vmem>>, vector<1x32xf32>
    %cst_33 = arith.constant dense<0.000000e+00> : vector<8xf32>
    %51 = vector.multi_reduction <add>, %48, %cst_33 [1] : vector<8x32xf32> to vector<8xf32>
    %52 = vector.shape_cast %51 : vector<8xf32> to vector<8x1xf32>
    %cst_34 = arith.constant 3.200000e+01 : f32
    %53 = vector.broadcast %cst_34 : f32 to vector<8x1xf32>
    %54 = arith.divf %52, %53 : vector<8x1xf32>
    %55 = vector.broadcast %54 : vector<8x1xf32> to vector<8x32xf32>
    %56 = arith.subf %48, %55 : vector<8x32xf32>
    %57 = arith.mulf %56, %56 : vector<8x32xf32>
    %cst_35 = arith.constant dense<0.000000e+00> : vector<8xf32>
    %58 = vector.multi_reduction <add>, %57, %cst_35 [1] : vector<8x32xf32> to vector<8xf32>
    %59 = vector.shape_cast %58 : vector<8xf32> to vector<8x1xf32>
    %cst_36 = arith.constant 3.200000e+01 : f32
    %60 = vector.broadcast %cst_36 : f32 to vector<8x1xf32>
    %61 = arith.divf %59, %60 : vector<8x1xf32>
    %62 = vector.broadcast %54 : vector<8x1xf32> to vector<8x32xf32>
    %63 = arith.subf %48, %62 : vector<8x32xf32>
    %cst_37 = arith.constant 9.99999974E-6 : f32
    %64 = vector.broadcast %cst_37 : f32 to vector<8x1xf32>
    %65 = arith.addf %61, %64 : vector<8x1xf32>
    %66 = math.rsqrt %65 : vector<8x1xf32>
    %67 = vector.broadcast %66 : vector<8x1xf32> to vector<8x32xf32>
    %68 = arith.mulf %63, %67 : vector<8x32xf32>
    %69 = vector.broadcast %49 : vector<1x32xf32> to vector<8x32xf32>
    %70 = arith.mulf %68, %69 : vector<8x32xf32>
    %71 = vector.broadcast %50 : vector<1x32xf32> to vector<8x32xf32>
    %72 = arith.addf %70, %71 : vector<8x32xf32>
    %c0_38 = arith.constant 0 : index
    %c0_39 = arith.constant 0 : index
    %c0_40 = arith.constant 0 : index
    %73 = vector.load %arg14[%c0_38, %c0_39, %c0_40] : memref<1x8x32xf32, #tpu.memory_space<vmem>>, vector<1x8x32xf32>
    %74 = vector.shape_cast %73 : vector<1x8x32xf32> to vector<8x32xf32>
    %75 = vector.shape_cast %72 : vector<8x32xf32> to vector<1x8x32xf32>
    tpu.vector_store %arg14[%c0_38, %c0_39, %c0_40], %75 {strides = array<i32>} : memref<1x8x32xf32, #tpu.memory_space<vmem>>, vector<1x8x32xf32>,
    return
  }
  func.func @transform_0(%arg0: i32, %arg1: i32) -> (i32, i32, i32) {
    %c0_i32 = arith.constant 0 : i32
    %c0_i32_0 = arith.constant 0 : i32
    return %arg0, %arg1, %c0_i32 : i32, i32, i32
  }
  func.func @transform_1(%arg0: i32, %arg1: i32) -> (i32, i32, i32) {
    %c0_i32 = arith.constant 0 : i32
    %c0_i32_0 = arith.constant 0 : i32
    return %arg0, %arg1, %c0_i32 : i32, i32, i32
  }
  func.func @transform_2(%arg0: i32, %arg1: i32) -> (i32, i32) {
    %c0_i32 = arith.constant 0 : i32
    %c0_i32_0 = arith.constant 0 : i32
    %c0_i32_1 = arith.constant 0 : i32
    return %c0_i32, %c0_i32_0 : i32, i32
  }
  func.func @transform_3(%arg0: i32, %arg1: i32) -> (i32, i32) {
    %c0_i32 = arith.constant 0 : i32
    %c0_i32_0 = arith.constant 0 : i32
    %c0_i32_1 = arith.constant 0 : i32
    return %c0_i32, %c0_i32_0 : i32, i32
  }
  func.func @transform_4(%arg0: i32, %arg1: i32) -> (i32, i32) {
    %c0_i32 = arith.constant 0 : i32
    %c0_i32_0 = arith.constant 0 : i32
    %c0_i32_1 = arith.constant 0 : i32
    return %c0_i32, %c0_i32_0 : i32, i32
  }
  func.func @transform_5(%arg0: i32, %arg1: i32) -> (i32, i32) {
    %c0_i32 = arith.constant 0 : i32
    %c0_i32_0 = arith.constant 0 : i32
    %c0_i32_1 = arith.constant 0 : i32
    return %c0_i32, %c0_i32_0 : i32, i32
  }
  func.func @transform_6(%arg0: i32, %arg1: i32) -> (i32, i32) {
    %c0_i32 = arith.constant 0 : i32
    %c0_i32_0 = arith.constant 0 : i32
    %c0_i32_1 = arith.constant 0 : i32
    return %c0_i32, %c0_i32_0 : i32, i32
  }
  func.func @transform_7(%arg0: i32, %arg1: i32) -> (i32, i32) {
    %c0_i32 = arith.constant 0 : i32
    %c0_i32_0 = arith.constant 0 : i32
    %c0_i32_1 = arith.constant 0 : i32
    return %c0_i32, %c0_i32_0 : i32, i32
  }
  func.func @transform_8(%arg0: i32, %arg1: i32) -> (i32, i32) {
    %c0_i32 = arith.constant 0 : i32
    %c0_i32_0 = arith.constant 0 : i32
    %c0_i32_1 = arith.constant 0 : i32
    return %c0_i32, %c0_i32_0 : i32, i32
  }
  func.func @transform_9(%arg0: i32, %arg1: i32) -> (i32, i32) {
    %c0_i32 = arith.constant 0 : i32
    %c0_i32_0 = arith.constant 0 : i32
    %c0_i32_1 = arith.constant 0 : i32
    return %c0_i32, %c0_i32_0 : i32, i32
  }
  func.func @transform_10(%arg0: i32, %arg1: i32) -> (i32, i32) {
    %c0_i32 = arith.constant 0 : i32
    %c0_i32_0 = arith.constant 0 : i32
    %c0_i32_1 = arith.constant 0 : i32
    return %c0_i32, %c0_i32_0 : i32, i32
  }
  func.func @transform_11(%arg0: i32, %arg1: i32) -> (i32, i32) {
    %c0_i32 = arith.constant 0 : i32
    %c0_i32_0 = arith.constant 0 : i32
    %c0_i32_1 = arith.constant 0 : i32
    return %c0_i32, %c0_i32_0 : i32, i32
  }
  func.func @transform_12(%arg0: i32, %arg1: i32) -> (i32, i32, i32) {
    %c0_i32 = arith.constant 0 : i32
    %c0_i32_0 = arith.constant 0 : i32
    return %arg0, %arg1, %c0_i32 : i32, i32, i32
  }
}

</mosaic_0001>

<bundles_post_ra>
// kernel: _lambda_.6
= control target key start
LH: loop header
LB: loop body
LE: loop exit
PB: predicated region body
PF: predicated region fallthrough
CT: control target
= control target key end

     0   :  { %s540_s18 = smov 0   ;;  %s542_s19 = smov 0   ;;  %s595_s0 = inlined_call_operand.vmem [shape: f32[2,8,32], index: 0, kind: input, shape index: {}]   ;;  %s596_s1 = inlined_call_operand.vmem [shape: f32[1,32], index: 1, kind: input, shape index: {}]   ;;  %s597_s2 = inlined_call_operand.vmem [shape: f32[1,32], index: 2, kind: input, shape index: {}]   ;;  %s598_s3 = inlined_call_operand.vmem [shape: bf16[32,96], index: 3, kind: input, shape index: {}]   ;;  %s599_s4 = inlined_call_operand.vmem [shape: f32[1,96], index: 4, kind: input, shape index: {}]   ;;  %s600_s5 = inlined_call_operand.vmem [shape: bf16[2,8,96], index: 5, kind: output, shape index: {}]  }
   0x1   :  { %s544_s20 = smov 0  }
   0x2 LB: > { %s27_s21 = sadd.s32 1, %s502_s19  ;;  %p432_p0 = scmp.ge.s32.totalorder %s506_s20, 1  ;;  %s506_s20 = sphi %s544_s20, %s15_s20   ;;  %s502_s19 = sphi %s542_s19, %s602_s19   ;;  %s498_s18 = sphi %s540_s18, %s601_s18  }
   0x3   : > { %p29_p1 = scmp.ge.s32.totalorder %s27_s21, 2  ;;  %p205_p2 = scmp.lt.s32.totalorder %s506_s20, 3 }
   0x5   : > { %s604_s21 = smov (%p29_p1, %s27_s21), 0  ;;  %p206_p3 = pnand %p432_p0, %p205_p2 }
   0x6   : > { %p237_p4 = scmp.lt.s32.totalorder (!%p206_p3), %s498_s18, 1  ;;  %vm255_vm0 = vcmask (!%p206_p3), 261120   ;;  %v480_v7 = vld [vmem:[%s598_s3] sm:$0xff] (!%p206_p3)   ;;  %v508_v8 = vmov (!%p206_p3), 0.0   ;;  %v481_v9 = vld [vmem:[%s598_s3 + $0x8] sm:$0xff] (!%p206_p3)   ;;  %vm509_vm1 = vmmov (!%p206_p3), 0  }
   0x7   : > { %209 = sbr.rel (%p206_p3) target bundleno = 550 (0x226), region = 40  ;;  %446 = vmatprep.subr.bf16.mxu0 (!%p206_p3), %v508_v8  ;;  %450 = vmatprep.mubr.msk.bf16.mxu0 (!%p206_p3), %vm509_vm1, %v508_v8  ;;  %v435_v14 = vld [vmem:[%s596_s1] ss:$0 sm:$0xff] (!%p206_p3)  ;;  %vm352_vm2 = vcmask (!%p206_p3), 781312  }
   0x8   : > { %447 = vmatpush3.bf16.msra.mxu0 (!%p206_p3), %v480_v7  ;;  %v436_v16 = vld [vmem:[%s597_s2] ss:$0 sm:$0xff] (!%p206_p3) }
   0x9   : > { %448 = vmatprep.subr.bf16.mxu0 (!%p206_p3), %v508_v8  ;;  %v437_v20 = vld [vmem:[%s599_s4] ss:$0 sm:$0xff] (!%p206_p3) }
   0xc   : > { %449 = vmatpush3.bf16.msra.mxu0 (!%p206_p3), %v481_v9 }
   0xe   : > { %s606_s18 = smov (!%p237_p4, %s498_s18), 1 }
   0xf   : > { %s433_s22 = sshll.u32 %s606_s18, 3  ;;  %s434_s11 = sshll.u32 %s606_s18, 2 }
  0x10   : > { %s243_s25 = scalar_lea.vmem %s595_s0, %s433_s22  ;;  %s250_s14 = scalar_lea.vmem %s600_s5, %s434_s11 }
  0x11   : > { %v252_v0 = vld [vmem:[%s243_s25] sm:$0xff] }
  0x12   : > { %v256_v1 = vsel %vm255_vm0, %v252_v0, 0.0 }
  0x13   : > { %257 = vadd.xlane.f32.xlu0 %v256_v1 }
  0xa0   : > { %v258_v2 = vpop.xlane.xlu0 %257 }
  0xa1   : > { %v260_v3 = vmul.f32 0.03125, %v258_v2 }
  0xa3   : > { %v261_v4 = vsub.f32 %v252_v0, %v260_v3 }
  0xa5   : > { %v262_v5 = vmul.f32 %v261_v4, %v261_v4 }
  0xa7   : > { %v263_v6 = vsel %vm255_vm0, %v262_v5, 0.0 }
  0xa8   : > { %264 = vadd.xlane.f32.xlu0 %v263_v6 }
 0x135   : > { %v265_v10 = vpop.xlane.xlu0 %264 }
 0x136   : > { %v266_v11 = vmul.f32 0.03125, %v265_v10 }
 0x138   : > { %v267_v12 = vadd.f32 1e-05, %v266_v11 }
 0x13a   : > { %482 = vrsqrt.f32 %v267_v12 }
 0x144   : > { %v483_v13 = vpop.eup %482 }
 0x145   : > { %v269_v15 = vmul.f32 %v483_v13, %v261_v4 }
 0x147   : > { %v276_v17 = vmul.f32 %v435_v14, %v269_v15 }
 0x149   : > { %v283_v18 = vadd.f32 %v436_v16, %v276_v17 }
 0x14b   : > { %v284_v19 = vpack.c.bf16 %v283_v18, %v283_v18 }
 0x14d   : > { %451 = vmatmul.mubr.msk.bf16.vlgmr.msra.gmra.mrb[0].mxu0 %vm255_vm0, %v284_v19 }
 0x220   : > { %v345_v21 = vpop.f32.mrb[0].mxu0 }
 0x221   : > { %v346_v22 = vadd.f32 %v437_v20, %v345_v21  ;;  %v452_v23 = vpop.f32.mrb[1].mxu0 }
 0x222   : > { %v348_v24 = vpop.f32.mrb[2].mxu0 }
 0x223   : > { %v351_v25 = vpack.c.bf16 %v346_v22, %v346_v22  ;;  %v453_v26 = vpop.f32.mrb[3].mxu0 }
 0x225   : > { %353 = vst.msk [vmem:[%s250_s14] sm:$0xf] %vm352_vm2, %v351_v25 }
 0x226 PF: > { %s15_s20 = sadd.s32 1, %s506_s20   ;;  %s601_s18 = smov %s502_s19 }
 0x227   : > { %p12_p5 = scmp.ge.s32.totalorder %s15_s20, 4   ;;  %s602_s19 = smov %s604_s21 }
 0x229   :  { %14 = sbr.rel (!%p12_p5) target bundleno = 2 (0x2), region = 70 }

// kernel: _lambda_.8
= control target key start
LH: loop header
LB: loop body
LE: loop exit
PB: predicated region body
PF: predicated region fallthrough
CT: control target
= control target key end

     0   :  { %s987_s13 = smov 0   ;;  %s989_s14 = smov 0   ;;  %s1107_s0 = inlined_call_operand.vmem [shape: bf16[2,8,32], index: 0, kind: input, shape index: {}]   ;;  %s1108_s1 = inlined_call_operand.vmem [shape: f32[2,8,32], index: 1, kind: input, shape index: {}]   ;;  %s1109_s2 = inlined_call_operand.vmem [shape: bf16[32,32], index: 2, kind: input, shape index: {}]   ;;  %s1110_s3 = inlined_call_operand.vmem [shape: f32[1,32], index: 3, kind: input, shape index: {}]   ;;  %s1111_s4 = inlined_call_operand.vmem [shape: f32[1,32], index: 4, kind: input, shape index: {}]   ;;  %s1112_s5 = inlined_call_operand.vmem [shape: f32[1,32], index: 5, kind: input, shape index: {}]   ;;  %s1113_s6 = inlined_call_operand.vmem [shape: bf16[32,128], index: 6, kind: input, shape index: {}]   ;;  %s1114_s7 = inlined_call_operand.vmem [shape: f32[1,128], index: 7, kind: input, shape index: {}]   ;;  %s1115_s8 = inlined_call_operand.vmem [shape: bf16[128,32], index: 8, kind: input, shape index: {}]   ;;  %s1116_s9 = inlined_call_operand.vmem [shape: f32[1,32], index: 9, kind: input, shape index: {}]   ;;  %s1117_s10 = inlined_call_operand.vmem [shape: f32[2,8,32], index: 10, kind: output, shape index: {}]  }
   0x1   :  { %s991_s15 = smov 0  }
   0x2 LB: > { %s32_s16 = sadd.s32 1, %s924_s14  ;;  %p790_p0 = scmp.ge.s32.totalorder %s928_s15, 1  ;;  %s928_s15 = sphi %s991_s15, %s20_s15   ;;  %s924_s14 = sphi %s989_s14, %s1119_s14   ;;  %s920_s13 = sphi %s987_s13, %s1118_s13  }
   0x3   : > { %p34_p1 = scmp.ge.s32.totalorder %s32_s16, 2  ;;  %p344_p2 = scmp.lt.s32.totalorder %s928_s15, 3 }
   0x5   : > { %s1121_s16 = smov (%p34_p1, %s32_s16), 0  ;;  %p345_p3 = pnand %p790_p0, %p344_p2 }
   0x6   : > { %v892_v0 = vld [vmem:[%s1109_s2] sm:$0xff] (!%p345_p3)   ;;  %v930_v1 = vmov (!%p345_p3), 0.0   ;;  %v893_v2 = vld [vmem:[%s1109_s2 + $0x8] sm:$0xff] (!%p345_p3)   ;;  %vm931_vm0 = vmmov (!%p345_p3), 0   ;;  %p393_p4 = scmp.lt.s32.totalorder (!%p345_p3), %s920_s13, 1  ;;  %vm439_vm1 = vcmask (!%p345_p3), 261120  }
   0x7   : > { %348 = sbr.rel (%p345_p3) target bundleno = 984 (0x3d8), region = 60  ;;  %830 = vmatprep.subr.bf16.mxu1 (!%p345_p3), %v930_v1  ;;  %846 = vmatprep.subr.bf16.mxu0 (!%p345_p3), %v930_v1  ;;  %v794_v4 = vld [vmem:[%s1110_s3] ss:$0 sm:$0xff] (!%p345_p3)  ;;  %v895_v19 = vld [vmem:[%s1113_s6 + $0x8] sm:$0xff] (!%p345_p3)   ;;  %v898_v22 = vld [vmem:[%s1115_s8 + $0x10] sm:$0xff] (!%p345_p3)  }
   0x8   : > { %831 = vmatpush3.bf16.msra.mxu1 (!%p345_p3), %v892_v0  ;;  %834 = vmatprep.mubr.msk.bf16.mxu1 (!%p345_p3), %vm931_vm0, %v930_v1  ;;  %v894_v18 = vld [vmem:[%s1113_s6] sm:$0xff] (!%p345_p3)   ;;  %v897_v21 = vld [vmem:[%s1115_s8 + $0x8] sm:$0xff] (!%p345_p3)   ;;  %v899_v23 = vld [vmem:[%s1115_s8 + $0x18] sm:$0xff] (!%p345_p3)  }
   0x9   : > { %832 = vmatprep.subr.bf16.mxu1 (!%p345_p3), %v930_v1  ;;  %862 = vmatprep.mubr.msk.bf16.mxu0 (!%p345_p3), %vm931_vm0, %v930_v1  ;;  %v896_v20 = vld [vmem:[%s1115_s8] sm:$0xff] (!%p345_p3)   ;;  %v901_v25 = vld [vmem:[%s1115_s8 + $0x28] sm:$0xff] (!%p345_p3)   ;;  %v902_v36 = vld [vmem:[%s1115_s8 + $0x30] sm:$0xff] (!%p345_p3)  }
   0xa   : > { %847 = vmatpush3.bf16.msra.mxu0 (!%p345_p3), %v896_v20  ;;  %v900_v24 = vld [vmem:[%s1115_s8 + $0x20] sm:$0xff] (!%p345_p3)   ;;  %v903_v37 = vld [vmem:[%s1115_s8 + $0x38] sm:$0xff] (!%p345_p3)  }
   0xb   : > { %848 = vmatprep.subr.bf16.mxu0 (!%p345_p3), %v930_v1  ;;  %v798_v30 = vld [vmem:[%s1111_s4] ss:$0 sm:$0xff] (!%p345_p3) }
   0xc   : > { %833 = vmatpush3.bf16.msra.mxu1 (!%p345_p3), %v893_v2  ;;  %v799_v32 = vld [vmem:[%s1112_s5] ss:$0 sm:$0xff] (!%p345_p3) }
   0xd   : > { %838 = vmatprep.subr.bf16.mxu1 (!%p345_p3), %v930_v1  ;;  %v800_v38 = vld [vmem:[%s1114_s7] ss:$0 sm:$0xff] (!%p345_p3) }
   0xe   : > { %s1123_s13 = smov (!%p393_p4, %s920_s13), 1  ;;  %849 = vmatpush3.bf16.msra.mxu0 %v897_v21  ;;  %v804_v46 = vld [vmem:[%s1116_s9] ss:$0 sm:$0xff] }
   0xf   : > { %s791_s21 = sshll.u32 %s1123_s13, 2  ;;  %s792_s25 = sshll.u32 %s1123_s13, 3  ;;  %850 = vmatprep.subr.bf16.mxu0 %v930_v1 }
  0x10   : > { %s399_s24 = scalar_lea.vmem %s1107_s0, %s791_s21  ;;  %s406_s28 = scalar_lea.vmem %s1108_s1, %s792_s25 }
  0x11   : > { %v415_v3 = vld [vmem:[%s399_s24] sm:$0xf]  ;;  %s413_s11 = scalar_lea.vmem %s1117_s10, %s792_s25 }
  0x12   : > { %835 = vmatmul.mubr.msk.bf16.vlgmr.msra.gmra.mrb[0].mxu1 %vm439_vm1, %v415_v3  ;;  %v483_v6 = vld [vmem:[%s406_s28] sm:$0xff]  ;;  %851 = vmatpush3.bf16.msra.mxu0 %v898_v22 }
  0x13   : > { %842 = vmatprep.mubr.msk.bf16.mxu1 %vm931_vm0, %v930_v1  ;;  %839 = vmatpush3.bf16.msra.mxu1 %v894_v18 }
  0x14   : > { %840 = vmatprep.subr.bf16.mxu1 %v930_v1  ;;  %852 = vmatprep.subr.bf16.mxu0 %v930_v1 }
  0x16   : > { %853 = vmatpush3.bf16.msra.mxu0 %v899_v23 }
  0x17   : > { %841 = vmatpush3.bf16.msra.mxu1 %v895_v19  ;;  %854 = vmatprep.subr.bf16.mxu0 %v930_v1 }
  0x1a   : > { %855 = vmatpush3.bf16.msra.mxu0 %v900_v24 }
  0x1b   : > { %856 = vmatprep.subr.bf16.mxu0 %v930_v1 }
  0x1e   : > { %857 = vmatpush3.bf16.msra.mxu0 %v901_v25 }
  0x1f   : > { %858 = vmatprep.subr.bf16.mxu0 %v930_v1 }
  0x22   : > { %859 = vmatpush3.bf16.msra.mxu0 %v902_v36 }
  0x23   : > { %860 = vmatprep.subr.bf16.mxu0 %v930_v1 }
  0x26   : > { %861 = vmatpush3.bf16.msra.mxu0 %v903_v37 }
  0xe5   : > { %v477_v5 = vpop.f32.mrb[0].mxu1 }
  0xe6   : > { %v478_v7 = vadd.f32 %v794_v4, %v477_v5  ;;  %v836_v8 = vpop.f32.mrb[1].mxu1 }
  0xe7   : > { %v480_v9 = vpop.f32.mrb[2].mxu1 }
  0xe8   : > { %v1034_v10 = vadd.f32 %v483_v6, %v478_v7  ;;  %v837_v11 = vpop.f32.mrb[3].mxu1 }
  0xea   : > { %v487_v12 = vsel %vm439_vm1, %v1034_v10, 0.0 }
  0xeb   : > { %488 = vadd.xlane.f32.xlu0 %v487_v12 }
 0x178   : > { %v489_v13 = vpop.xlane.xlu0 %488 }
 0x179   : > { %v491_v14 = vmul.f32 0.03125, %v489_v13 }
 0x17b   : > { %v492_v15 = vsub.f32 %v1034_v10, %v491_v14 }
 0x17d   : > { %v493_v16 = vmul.f32 %v492_v15, %v492_v15 }
 0x17f   : > { %v494_v17 = vsel %vm439_vm1, %v493_v16, 0.0 }
 0x180   : > { %495 = vadd.xlane.f32.xlu0 %v494_v17 }
 0x20d   : > { %v496_v26 = vpop.xlane.xlu0 %495 }
 0x20e   : > { %v497_v27 = vmul.f32 0.03125, %v496_v26 }
 0x210   : > { %v498_v28 = vadd.f32 1e-05, %v497_v27 }
 0x212   : > { %904 = vrsqrt.f32 %v498_v28 }
 0x21c   : > { %v905_v29 = vpop.eup %904 }
 0x21d   : > { %v500_v31 = vmul.f32 %v905_v29, %v492_v15 }
 0x21f   : > { %v507_v33 = vmul.f32 %v798_v30, %v500_v31 }
 0x221   : > { %v514_v34 = vadd.f32 %v799_v32, %v507_v33 }
 0x223   : > { %v515_v35 = vpack.c.bf16 %v514_v34, %v514_v34 }
 0x225   : > { %843 = vmatmul.mubr.msk.bf16.vlgmr.msra.gmra.mrb[4].mxu1 %vm439_vm1, %v515_v35 }
 0x2f8   : > { %v576_v39 = vpop.f32.mrb[4].mxu1 }
 0x2f9   : > { %v577_v40 = vadd.f32 %v800_v38, %v576_v39  ;;  %v844_v41 = vpop.f32.mrb[5].mxu1 }
 0x2fa   : > { %v579_v42 = vpop.f32.mrb[6].mxu1 }
 0x2fb   : > { %v582_v43 = vmax.f32 %v577_v40, 0.0  ;;  %v845_v44 = vpop.f32.mrb[7].mxu1 }
 0x2fd   : > { %v583_v45 = vpack.c.bf16 %v582_v43, %v582_v43 }
 0x2ff   : > { %863 = vmatmul.mubr.bf16.vlgmr.msra.gmra.mrb[0].mxu0 %v583_v45 }
 0x3d2   : > { %v689_v47 = vpop.f32.mrb[0].mxu0 }
 0x3d3   : > { %v690_v48 = vadd.f32 %v804_v46, %v689_v47  ;;  %v864_v49 = vpop.f32.mrb[1].mxu0 }
 0x3d4   : > { %v692_v50 = vpop.f32.mrb[2].mxu0 }
 0x3d5   : > { %v695_v51 = vadd.f32 %v690_v48, %v1034_v10  ;;  %v865_v52 = vpop.f32.mrb[3].mxu0 }
 0x3d7   : > { %696 = vst.msk [vmem:[%s413_s11] sm:$0xff] %vm439_vm1, %v695_v51 }
 0x3d8 PF: > { %s20_s15 = sadd.s32 1, %s928_s15   ;;  %s1118_s13 = smov %s924_s14 }
 0x3d9   : > { %p17_p5 = scmp.ge.s32.totalorder %s20_s15, 4   ;;  %s1119_s14 = smov %s1121_s16 }
 0x3db   :  { %19 = sbr.rel (!%p17_p5) target bundleno = 2 (0x2), region = 93 }

// kernel: _lambda_.7
= control target key start
LH: loop header
LB: loop body
LE: loop exit
PB: predicated region body
PF: predicated region fallthrough
CT: control target
= control target key end

     0   :  { %s1198_s12 = smov 0   ;;  %s1200_s13 = smov 0   ;;  %s1380_s0 = inlined_call_operand.vmem [shape: bf16[2,4,8,8], index: 0, kind: input, shape index: {}]   ;;  %s1381_s1 = inlined_call_operand.vmem [shape: bf16[2,4,8,8], index: 1, kind: input, shape index: {}]   ;;  %s1382_s2 = inlined_call_operand.vmem [shape: bf16[2,4,8,8], index: 2, kind: input, shape index: {}]   ;;  %s1383_s3 = inlined_call_operand.vmem [shape: bf16[2,4,8,8], index: 3, kind: output, shape index: {}]  }
   0x1   :  { %s1202_s14 = smov 0  }
   0x2 LB: > { %s32_s15 = sadd.s32 1, %s1168_s13  ;;  %p1009_p0 = scmp.ge.s32.totalorder %s1172_s14, 1  ;;  %s1172_s14 = sphi %s1202_s14, %s13_s14   ;;  %s1168_s13 = sphi %s1200_s13, %s1385_s13   ;;  %s1164_s12 = sphi %s1198_s12, %s1384_s12  }
   0x3   : > { %p34_p1 = scmp.ge.s32.totalorder %s32_s15, 2  ;;  %p193_p2 = scmp.lt.s32.totalorder %s1172_s14, 3 }
   0x5   : > { %s1387_s15 = smov (%p34_p1, %s32_s15), 0  ;;  %p194_p3 = pnand %p1009_p0, %p193_p2 }
   0x6   : > { %p239_p4 = scmp.lt.s32.totalorder (!%p194_p3), %s1164_s12, 1  ;;  %vm285_vm0 = vcmask (!%p194_p3), 64512   ;;  %v1174_v0 = vmov (!%p194_p3), 0.0   ;;  %vm1175_vm1 = vmmov (!%p194_p3), 0   ;;  %vm276_vm2 = vcmask (!%p194_p3), 7168  }
   0x7   : > { %197 = sbr.rel (%p194_p3) target bundleno = 838 (0x346), region = 32  ;;  %1048 = vmatprep.subr.bf16.mxu0 (!%p194_p3), %v1174_v0  ;;  %286 = vst.msk [vmem:[#allocation4] sm:$0xff] (!%p194_p3), %vm285_vm0, %v1174_v0  ;;  %287 = vst.msk [vmem:[#allocation4 + $0x8] sm:$0xff] (!%p194_p3), %vm285_vm0, %v1174_v0  ;;  %1054 = vmatprep.subr.bf16.mxu1 (!%p194_p3), %v1174_v0  ;;  %v1176_v13 = vmov (!%p194_p3), -1e+30   ;;  %v494_v14 = vlaneseq (!%p194_p3)  ;;  %v1177_v45 = vmov (!%p194_p3), 0  }
   0x8   : > { %288 = vst.msk [vmem:[#allocation4 + $0x10] sm:$0xff] (!%p194_p3), %vm285_vm0, %v1174_v0  ;;  %289 = vst.msk [vmem:[#allocation4 + $0x18] sm:$0xff] (!%p194_p3), %vm285_vm0, %v1174_v0  ;;  %1050 = vmatprep.mubr.msk.bf16.mxu0 (!%p194_p3), %vm1175_vm1, %v1174_v0  ;;  %1056 = vmatprep.mubr.msk.bf16.mxu1 (!%p194_p3), %vm1175_vm1, %v1174_v0  ;;  %vm641_vm4 = vcmask (!%p194_p3), 1043456   ;;  %vm878_vm5 = vcmask (!%p194_p3), 60416  }
   0x9   : > { %277 = vst.msk [vmem:[#allocation2] sm:$0xff] (!%p194_p3), %vm276_vm2, %v1176_v13  ;;  %278 = vst.msk [vmem:[#allocation2 + $0x8] sm:$0xff] (!%p194_p3), %vm276_vm2, %v1176_v13  ;;  %v495_v15 = vshrl.u32 (!%p194_p3), %v494_v14, 7  ;;  %v499_v16 = vand.u32 (!%p194_p3), 127, %v494_v14  ;;  %1124 = vset.pattern.permute.xlu0 (!%p194_p3), %v1177_v45  ;;  %1125 = vset.pattern.permute.xlu1 (!%p194_p3), %v1177_v45 }
   0xa   : > { %279 = vst.msk [vmem:[#allocation2 + $0x10] sm:$0xff] (!%p194_p3), %vm276_vm2, %v1176_v13  ;;  %280 = vst.msk [vmem:[#allocation2 + $0x18] sm:$0xff] (!%p194_p3), %vm276_vm2, %v1176_v13 }
   0xb   : > { %281 = vst.msk [vmem:[#allocation3] sm:$0xff] (!%p194_p3), %vm276_vm2, %v1174_v0  ;;  %282 = vst.msk [vmem:[#allocation3 + $0x8] sm:$0xff] (!%p194_p3), %vm276_vm2, %v1174_v0  ;;  %vm502_vm3 = vcmp.le.s32.totalorder (!%p194_p3), %v499_v16, %v495_v15 }
   0xc   : > { %283 = vst.msk [vmem:[#allocation3 + $0x10] sm:$0xff] (!%p194_p3), %vm276_vm2, %v1174_v0  ;;  %284 = vst.msk [vmem:[#allocation3 + $0x18] sm:$0xff] (!%p194_p3), %vm276_vm2, %v1174_v0 }
   0xe   : > { %s1389_s12 = smov (!%p239_p4, %s1164_s12), 1 }
   0xf   : > { %s1230_s16 = sshll.u32 %s1389_s12, 4 }
  0x10   : > { %s254_s19 = scalar_lea.vmem %s1381_s1, %s1230_s16  ;;  %s246_s22 = scalar_lea.vmem %s1380_s0, %s1230_s16  ;;  %v1286_v46 = vld [vmem:[#allocation2] sm:$0xff]  ;;  %v1291_v49 = vld [vmem:[#allocation2 + $0x8] sm:$0xff] }
  0x11   : > { %v301_v1 = vld [vmem:[%s254_s19] sm:$0xf]  ;;  %v302_v2 = vld [vmem:[%s254_s19 + $0x4] sm:$0xf]  ;;  %v303_v5 = vld [vmem:[%s254_s19 + $0x8] sm:$0xf]  ;;  %s262_s25 = scalar_lea.vmem %s1382_s2, %s1230_s16  ;;  %s270_s28 = scalar_lea.vmem %s1383_s3, %s1230_s16 }
  0x12   : > { %v310_v3 = vsel %vm285_vm0, %v301_v1, 0  ;;  %v356_v4 = vsel %vm285_vm0, %v302_v2, 0  ;;  %v304_v6 = vld [vmem:[%s254_s19 + $0xc] sm:$0xf]  ;;  %v297_v7 = vld [vmem:[%s246_s22] sm:$0xf] }
  0x13   : > { %1049 = vmatpush3.bf16.xpose.msra.mxu0 %v310_v3  ;;  %1055 = vmatpush3.bf16.xpose.msra.mxu1 %v356_v4  ;;  %v298_v8 = vld [vmem:[%s246_s22 + $0x4] sm:$0xf]  ;;  %v402_v9 = vsel %vm285_vm0, %v303_v5, 0  ;;  %v448_v10 = vsel %vm285_vm0, %v304_v6, 0  ;;  %v299_v11 = vld [vmem:[%s246_s22 + $0x8] sm:$0xf] }
  0x14   : > { %1060 = vmatprep.subr.bf16.mxu0 %v1174_v0  ;;  %1066 = vmatprep.subr.bf16.mxu1 %v1174_v0  ;;  %v300_v12 = vld [vmem:[%s246_s22 + $0xc] sm:$0xf]  ;;  %v1301_v53 = vld [vmem:[#allocation2 + $0x10] sm:$0xff]  ;;  %v1311_v57 = vld [vmem:[#allocation2 + $0x18] sm:$0xff] }
  0x15   : > { %v634_v62 = vld [vmem:[%s262_s25] sm:$0xf]  ;;  %v635_v1 = vld [vmem:[%s262_s25 + $0x4] sm:$0xf]  ;;  %v636_v3 = vld [vmem:[%s262_s25 + $0x8] sm:$0xf] }
  0x16   : > { %v643_v63 = vsel %vm641_vm4, %v634_v62, 0  ;;  %v689_v2 = vsel %vm641_vm4, %v635_v1, 0  ;;  %v735_v4 = vsel %vm641_vm4, %v636_v3, 0  ;;  %v637_v5 = vld [vmem:[%s262_s25 + $0xc] sm:$0xf]  ;;  %v575_v45 = vld [vmem:[#allocation3 + $0x10] sm:$0xff] }
  0x17   : > { %v781_v6 = vsel %vm641_vm4, %v637_v5, 0  ;;  %v602_v62 = vld [vmem:[#allocation4] sm:$0xff] }
  0x1a   : > { %1051 = vmatmul.mubr.msk.bf16.vlgmr.msra.gmra.mrb[0].mxu0 %vm285_vm0, %v297_v7  ;;  %1057 = vmatmul.mubr.msk.bf16.vlgmr.msra.gmra.mrb[0].mxu1 %vm285_vm0, %v298_v8 }
  0x1b   : > { %1061 = vmatpush3.bf16.xpose.msra.mxu0 %v402_v9  ;;  %1067 = vmatpush3.bf16.xpose.msra.mxu1 %v448_v10 }
  0x1c   : > { %1062 = vmatprep.mubr.msk.bf16.mxu0 %vm1175_vm1, %v1174_v0  ;;  %1068 = vmatprep.mubr.msk.bf16.mxu1 %vm1175_vm1, %v1174_v0 }
  0x1d   : > { %1072 = vmatprep.subr.bf16.mxu0 %v1174_v0  ;;  %1078 = vmatprep.subr.bf16.mxu1 %v1174_v0 }
  0x22   : > { %1063 = vmatmul.mubr.msk.bf16.vlgmr.msra.gmra.mrb[4].mxu0 %vm285_vm0, %v299_v11  ;;  %1069 = vmatmul.mubr.msk.bf16.vlgmr.msra.gmra.mrb[4].mxu1 %vm285_vm0, %v300_v12 }
  0x23   : > { %1074 = vmatprep.mubr.msk.bf16.mxu0 %vm1175_vm1, %v1174_v0  ;;  %1080 = vmatprep.mubr.msk.bf16.mxu1 %vm1175_vm1, %v1174_v0 }
  0x24   : > { %1073 = vmatpush3.bf16.msra.mxu0 %v643_v63  ;;  %1079 = vmatpush3.bf16.msra.mxu1 %v689_v2  ;;  %v603_v2 = vld [vmem:[#allocation4 + $0x8] sm:$0xff] }
  0x25   : > { %1084 = vmatprep.subr.bf16.mxu0 %v1174_v0  ;;  %1090 = vmatprep.subr.bf16.mxu1 %v1174_v0 }
  0xed   : > { %v346_v17 = vpop.f32.mrb[0].mxu0  ;;  %v392_v18 = vpop.f32.mrb[0].mxu1 }
  0xee   : > { %v490_v19 = vmul.f32 0.35355338, %v346_v17  ;;  %v1052_v20 = vpop.f32.mrb[1].mxu0  ;;  %v491_v21 = vmul.f32 0.35355338, %v392_v18  ;;  %v1058_v22 = vpop.f32.mrb[1].mxu1 }
  0xef   : > { %v349_v23 = vpop.f32.mrb[2].mxu0  ;;  %v395_v24 = vpop.f32.mrb[2].mxu1 }
  0xf0   : > { %v1053_v25 = vpop.f32.mrb[3].mxu0  ;;  %v1059_v26 = vpop.f32.mrb[3].mxu1  ;;  %v1273_v27 = vsel %vm502_vm3, %v490_v19, -10000.0  ;;  %v1276_v28 = vsel %vm502_vm3, %v491_v21, -10000.0 }
  0xf1   : > { %v513_v29 = vsel %vm285_vm0, %v1273_v27, -inf  ;;  %v516_v30 = vsel %vm285_vm0, %v1276_v28, -inf }
  0xf2   : > { %514 = vmax.xlane.f32.xlu0 %v513_v29 }
  0xf5   : > { %v438_v31 = vpop.f32.mrb[4].mxu0  ;;  %v484_v32 = vpop.f32.mrb[4].mxu1 }
  0xf6   : > { %v492_v33 = vmul.f32 0.35355338, %v438_v31  ;;  %517 = vmax.xlane.f32.xlu0 %v516_v30  ;;  %v1064_v34 = vpop.f32.mrb[5].mxu0  ;;  %v493_v35 = vmul.f32 0.35355338, %v484_v32  ;;  %v1070_v36 = vpop.f32.mrb[5].mxu1 }
  0xf7   : > { %v441_v37 = vpop.f32.mrb[6].mxu0  ;;  %v487_v38 = vpop.f32.mrb[6].mxu1 }
  0xf8   : > { %v1065_v39 = vpop.f32.mrb[7].mxu0  ;;  %v1071_v40 = vpop.f32.mrb[7].mxu1  ;;  %v507_v41 = vsel %vm502_vm3, %v492_v33, -10000.0  ;;  %v508_v42 = vsel %vm502_vm3, %v493_v35, -10000.0  ;;  %v573_v38 = vld [vmem:[#allocation3] sm:$0xff] }
  0xf9   : > { %v519_v43 = vsel %vm285_vm0, %v507_v41, -inf  ;;  %v522_v44 = vsel %vm285_vm0, %v508_v42, -inf }
  0xfa   : > { %520 = vmax.xlane.f32.xlu1 %v519_v43 }
  0xfe   : > { %523 = vmax.xlane.f32.xlu1 %v522_v44 }
 0x17f   : > { %v515_v47 = vpop.xlane.xlu0 %514 }
 0x180   : > { %v1289_v48 = vmax.f32 %v1286_v46, %v515_v47 }
 0x182   : > { %v529_v50 = vsub.f32 %v1286_v46, %v1289_v48  ;;  %831 = vst.msk [vmem:[#allocation2] sm:$0xff] %vm276_vm2, %v1289_v48  ;;  %543 = vperm.xlu0 %1124, %v1289_v48  }
 0x183   : > { %v518_v51 = vpop.xlane.xlu0 %517 }
 0x184   : > { %v1299_v52 = vmax.f32 %v1291_v49, %v518_v51 }
 0x186   : > { %v530_v54 = vsub.f32 %v1291_v49, %v1299_v52  ;;  %832 = vst.msk [vmem:[#allocation2 + $0x8] sm:$0xff] %vm276_vm2, %v1299_v52  ;;  %548 = vperm.xlu1 %1125, %v1299_v52   ;;  %v576_v49 = vld [vmem:[#allocation3 + $0x18] sm:$0xff] }
 0x187   : > { %v521_v55 = vpop.xlane.xlu1 %520 }
 0x188   : > { %v1309_v56 = vmax.f32 %v1301_v53, %v521_v55  ;;  %v535_v29 = vmul.f32 1.442695, %v530_v54 }
 0x18a   : > { %v531_v58 = vsub.f32 %v1301_v53, %v1309_v56  ;;  %833 = vst.msk [vmem:[#allocation2 + $0x10] sm:$0xff] %vm276_vm2, %v1309_v56  ;;  %553 = vperm.xlu1 %1125, %v1309_v56  }
 0x18b   : > { %v524_v59 = vpop.xlane.xlu1 %523 }
 0x18c   : > { %v1319_v60 = vmax.f32 %v1311_v57, %v524_v59  ;;  %v537_v32 = vmul.f32 1.442695, %v531_v58 }
 0x18e   : > { %v532_v61 = vsub.f32 %v1311_v57, %v1319_v60  ;;  %834 = vst.msk [vmem:[#allocation2 + $0x18] sm:$0xff] %vm276_vm2, %v1319_v60  ;;  %558 = vperm.xlu1 %1125, %v1319_v60  }
 0x190   : > { %v539_v33 = vmul.f32 1.442695, %v532_v61 }
 0x201   : > { %v544_v7 = vpop.permute.xlu0 %543 }
 0x202   : > { %v561_v8 = vsub.f32 %v1273_v27, %v544_v7 }
 0x204   : > { %v565_v9 = vmul.f32 1.442695, %v561_v8 }
 0x205   : > { %v549_v10 = vpop.permute.xlu1 %548 }
 0x206   : > { %1126 = vpow2.f32 %v565_v9  ;;  %v562_v11 = vsub.f32 %v1276_v28, %v549_v10 }
 0x208   : > { %v567_v12 = vmul.f32 1.442695, %v562_v11  ;;  %v604_v11 = vld [vmem:[#allocation4 + $0x10] sm:$0xff] }
 0x209   : > { %v554_v13 = vpop.permute.xlu1 %553 }
 0x20a   : > { %1128 = vpow2.f32 %v567_v12  ;;  %v563_v14 = vsub.f32 %v507_v41, %v554_v13  ;;  %v574_v41 = vld [vmem:[#allocation3 + $0x8] sm:$0xff] }
 0x20c   : > { %v569_v15 = vmul.f32 1.442695, %v563_v14 }
 0x20d   : > { %v559_v16 = vpop.permute.xlu1 %558 }
 0x20e   : > { %1130 = vpow2.f32 %v569_v15  ;;  %v564_v17 = vsub.f32 %v508_v42, %v559_v16 }
 0x210   : > { %v1127_v18 = vpop.eup %1126  ;;  %v571_v19 = vmul.f32 1.442695, %v564_v17 }
 0x211   : > { %v581_v20 = vsel %vm285_vm0, %v1127_v18, 0.0  ;;  %v630_v21 = vpack.c.bf16 %v1127_v18, %v1127_v18  ;;  %v605_v18 = vld [vmem:[#allocation4 + $0x18] sm:$0xff] }
 0x212   : > { %1132 = vpow2.f32 %v571_v19  ;;  %582 = vadd.xlane.f32.xlu1 %v581_v20 }
 0x213   : > { %1075 = vmatmul.mubr.msk.bf16.vlgmr.msra.gmra.mrb[8].mxu0 %vm285_vm0, %v630_v21  ;;  %1134 = vpow2.f32 %v535_v29 }
 0x214   : > { %v1129_v22 = vpop.eup %1128  ;;  %1085 = vmatpush3.bf16.msra.mxu0 %v735_v4  ;;  %1086 = vmatprep.mubr.msk.bf16.mxu0 %vm1175_vm1, %v1174_v0 }
 0x215   : > { %v584_v23 = vsel %vm285_vm0, %v1129_v22, 0.0  ;;  %v631_v24 = vpack.c.bf16 %v1129_v22, %v1129_v22 }
 0x216   : > { %585 = vadd.xlane.f32.xlu0 %v584_v23 }
 0x217   : > { %1081 = vmatmul.mubr.msk.bf16.vlgmr.msra.gmra.mrb[8].mxu1 %vm285_vm0, %v631_v24 }
 0x218   : > { %v1131_v25 = vpop.eup %1130  ;;  %1091 = vmatpush3.bf16.msra.mxu1 %v781_v6  ;;  %1092 = vmatprep.mubr.msk.bf16.mxu1 %vm1175_vm1, %v1174_v0  ;;  %v533_v0 = vmul.f32 1.442695, %v529_v50 }
 0x219   : > { %v587_v26 = vsel %vm285_vm0, %v1131_v25, 0.0  ;;  %v632_v27 = vpack.c.bf16 %v1131_v25, %v1131_v25 }
 0x21a   : > { %588 = vadd.xlane.f32.xlu1 %v587_v26  ;;  %1136 = vpow2.f32 %v533_v0 }
 0x21b   : > { %1087 = vmatmul.mubr.msk.bf16.vlgmr.msra.gmra.mrb[12].mxu0 %vm285_vm0, %v632_v27  ;;  %1138 = vpow2.f32 %v537_v32 }
 0x21c   : > { %v1133_v28 = vpop.eup %1132  ;;  %1140 = vpow2.f32 %v539_v33 }
 0x21d   : > { %v590_v30 = vsel %vm285_vm0, %v1133_v28, 0.0  ;;  %v633_v31 = vpack.c.bf16 %v1133_v28, %v1133_v28  ;;  %v1135_v34 = vpop.eup %1134 }
 0x21e   : > { %591 = vadd.xlane.f32.xlu1 %v590_v30  ;;  %v578_v43 = vmul.f32 %v1135_v34, %v574_v41 }
 0x21f   : > { %1093 = vmatmul.mubr.msk.bf16.vlgmr.msra.gmra.mrb[12].mxu1 %vm285_vm0, %v633_v31 }
 0x224   : > { %v1137_v35 = vpop.eup %1136 }
 0x225   : > { %v1139_v36 = vpop.eup %1138  ;;  %v577_v39 = vmul.f32 %v1137_v35, %v573_v38 }
 0x226   : > { %v1141_v37 = vpop.eup %1140  ;;  %v579_v47 = vmul.f32 %v1139_v36, %v575_v45 }
 0x227   : > { %v580_v52 = vmul.f32 %v1141_v37, %v576_v49 }
 0x22c   : > { %613 = vperm.xlu0 %1124, %v1135_v34  }
 0x22f   : > { %608 = vperm.xlu1 %1125, %v1137_v35  }
 0x233   : > { %618 = vperm.xlu1 %1125, %v1139_v36  }
 0x237   : > { %623 = vperm.xlu1 %1125, %v1141_v37  }
 0x29f   : > { %v583_v40 = vpop.xlane.xlu1 %582 }
 0x2a0   : > { %v593_v42 = vadd.f32 %v583_v40, %v577_v39 }
 0x2a2   : > { %598 = vst.msk [vmem:[#allocation3] sm:$0xff] %vm276_vm2, %v593_v42 }
 0x2a3   : > { %v586_v44 = vpop.xlane.xlu0 %585 }
 0x2a4   : > { %v594_v46 = vadd.f32 %v586_v44, %v578_v43 }
 0x2a6   : > { %599 = vst.msk [vmem:[#allocation3 + $0x8] sm:$0xff] %vm276_vm2, %v594_v46 }
 0x2a7   : > { %v589_v48 = vpop.xlane.xlu1 %588 }
 0x2a8   : > { %v595_v50 = vadd.f32 %v589_v48, %v579_v47 }
 0x2a9   : > { %v842_v51 = vld [vmem:[#allocation3] sm:$0xff] }
 0x2aa   : > { %600 = vst.msk [vmem:[#allocation3 + $0x10] sm:$0xff] %vm276_vm2, %v595_v50  ;;  %1142 = vrcp.f32 %v842_v51 }
 0x2ab   : > { %v592_v53 = vpop.xlane.xlu1 %591  ;;  %v614_v3 = vpop.permute.xlu0 %613 }
 0x2ac   : > { %v596_v54 = vadd.f32 %v592_v53, %v580_v52  ;;  %v627_v9 = vmul.f32 %v614_v3, %v603_v2 }
 0x2ad   : > { %v843_v55 = vld [vmem:[#allocation3 + $0x8] sm:$0xff] }
 0x2ae   : > { %601 = vst.msk [vmem:[#allocation3 + $0x18] sm:$0xff] %vm276_vm2, %v596_v54  ;;  %1144 = vrcp.f32 %v843_v55 }
 0x2af   : > { %v609_v63 = vpop.permute.xlu1 %608 }
 0x2b0   : > { %v626_v1 = vmul.f32 %v609_v63, %v602_v62 }
 0x2b1   : > { %v844_v56 = vld [vmem:[#allocation3 + $0x10] sm:$0xff] }
 0x2b2   : > { %1146 = vrcp.f32 %v844_v56 }
 0x2b3   : > { %v619_v7 = vpop.permute.xlu1 %618 }
 0x2b4   : > { %v1143_v57 = vpop.eup %1142  ;;  %v628_v16 = vmul.f32 %v619_v7, %v604_v11 }
 0x2b5   : > { %852 = vperm.xlu1 %1125, %v1143_v57   ;;  %v845_v58 = vld [vmem:[#allocation3 + $0x18] sm:$0xff] }
 0x2b6   : > { %1148 = vrcp.f32 %v845_v58 }
 0x2b7   : > { %v624_v19 = vpop.permute.xlu1 %623 }
 0x2b8   : > { %v1145_v59 = vpop.eup %1144  ;;  %v629_v24 = vmul.f32 %v624_v19, %v605_v18 }
 0x2b9   : > { %857 = vperm.xlu0 %1124, %v1145_v59  }
 0x2bc   : > { %v1147_v60 = vpop.eup %1146 }
 0x2bd   : > { %862 = vperm.xlu1 %1125, %v1147_v60  }
 0x2c0   : > { %v1149_v61 = vpop.eup %1148 }
 0x2c1   : > { %867 = vperm.xlu0 %1124, %v1149_v61  }
 0x2e6   : > { %v679_v4 = vpop.f32.mrb[8].mxu0 }
 0x2e7   : > { %v823_v5 = vadd.f32 %v679_v4, %v626_v1  ;;  %v1076_v6 = vpop.f32.mrb[9].mxu0 }
 0x2e8   : > { %v682_v8 = vpop.f32.mrb[10].mxu0 }
 0x2e9   : > { %827 = vst.msk [vmem:[#allocation4] sm:$0xff] %vm285_vm0, %v823_v5  ;;  %v1077_v10 = vpop.f32.mrb[11].mxu0 }
 0x2ea   : > { %v725_v12 = vpop.f32.mrb[8].mxu1 }
 0x2eb   : > { %v824_v13 = vadd.f32 %v725_v12, %v627_v9  ;;  %v1082_v14 = vpop.f32.mrb[9].mxu1 }
 0x2ec   : > { %v728_v15 = vpop.f32.mrb[10].mxu1 }
 0x2ed   : > { %828 = vst.msk [vmem:[#allocation4 + $0x8] sm:$0xff] %vm285_vm0, %v824_v13  ;;  %v1083_v17 = vpop.f32.mrb[11].mxu1 }
 0x2ee   : > { %v771_v20 = vpop.f32.mrb[12].mxu0 }
 0x2ef   : > { %v825_v21 = vadd.f32 %v771_v20, %v628_v16  ;;  %v1088_v22 = vpop.f32.mrb[13].mxu0 }
 0x2f0   : > { %v774_v23 = vpop.f32.mrb[14].mxu0  ;;  %v838_v0 = vld [vmem:[#allocation4] sm:$0xff] }
 0x2f1   : > { %829 = vst.msk [vmem:[#allocation4 + $0x10] sm:$0xff] %vm285_vm0, %v825_v21  ;;  %v1089_v25 = vpop.f32.mrb[15].mxu0 }
 0x2f2   : > { %v817_v26 = vpop.f32.mrb[12].mxu1 }
 0x2f3   : > { %v826_v27 = vadd.f32 %v817_v26, %v629_v24  ;;  %v1094_v28 = vpop.f32.mrb[13].mxu1 }
 0x2f4   : > { %v820_v29 = vpop.f32.mrb[14].mxu1  ;;  %v839_v34 = vld [vmem:[#allocation4 + $0x8] sm:$0xff] }
 0x2f5   : > { %830 = vst.msk [vmem:[#allocation4 + $0x18] sm:$0xff] %vm285_vm0, %v826_v27  ;;  %v1095_v30 = vpop.f32.mrb[15].mxu1 }
 0x2f8   : > { %v840_v39 = vld [vmem:[#allocation4 + $0x10] sm:$0xff] }
 0x2fc   : > { %v841_v43 = vld [vmem:[#allocation4 + $0x18] sm:$0xff] }
 0x334   : > { %v853_v31 = vpop.permute.xlu1 %852 }
 0x335   : > { %v870_v32 = vmul.f32 %v853_v31, %v838_v0 }
 0x337   : > { %v874_v33 = vpack.c.bf16 %v870_v32, %v870_v32 }
 0x338   : > { %v858_v35 = vpop.permute.xlu0 %857 }
 0x339   : > { %879 = vst.msk [vmem:[%s270_s28] sm:$0xf] %vm878_vm5, %v874_v33  ;;  %v871_v36 = vmul.f32 %v858_v35, %v839_v34 }
 0x33b   : > { %v875_v37 = vpack.c.bf16 %v871_v36, %v871_v36 }
 0x33c   : > { %v863_v38 = vpop.permute.xlu1 %862 }
 0x33d   : > { %880 = vst.msk [vmem:[%s270_s28 + $0x4] sm:$0xf] %vm878_vm5, %v875_v37  ;;  %v872_v40 = vmul.f32 %v863_v38, %v840_v39 }
 0x33f   : > { %v876_v41 = vpack.c.bf16 %v872_v40, %v872_v40 }
 0x340   : > { %v868_v42 = vpop.permute.xlu0 %867 }
 0x341   : > { %881 = vst.msk [vmem:[%s270_s28 + $0x8] sm:$0xf] %vm878_vm5, %v876_v41  ;;  %v873_v44 = vmul.f32 %v868_v42, %v841_v43 }
 0x343   : > { %v877_v45 = vpack.c.bf16 %v873_v44, %v873_v44 }
 0x345   : > { %882 = vst.msk [vmem:[%s270_s28 + $0xc] sm:$0xf] %vm878_vm5, %v877_v45 }
 0x346 PF: > { %s13_s14 = sadd.s32 1, %s1172_s14   ;;  %s1384_s12 = smov %s1168_s13 }
 0x347   : > { %p10_p5 = scmp.ge.s32.totalorder %s13_s14, 4   ;;  %s1385_s13 = smov %s1387_s15 }
 0x349   :  { %12 = sbr.rel (!%p10_p5) target bundleno = 2 (0x2), region = 80 }

// kernel: _lambda_.11
= control target key start
LH: loop header
LB: loop body
LE: loop exit
PB: predicated region body
PF: predicated region fallthrough
CT: control target
= control target key end

     0   :  { %s1379_s0 = inlined_call_operand.vmem [shape: bf16[2,8,32], index: 0, kind: input, shape index: {}]   ;;  %s1380_s1 = inlined_call_operand.vmem [shape: f32[2,8,32], index: 1, kind: input, shape index: {}]   ;;  %s1381_s2 = inlined_call_operand.vmem [shape: bf16[32,32], index: 2, kind: input, shape index: {}]   ;;  %s1382_s3 = inlined_call_operand.vmem [shape: f32[1,32], index: 3, kind: input, shape index: {}]   ;;  %s1383_s4 = inlined_call_operand.vmem [shape: f32[1,32], index: 4, kind: input, shape index: {}]   ;;  %s1384_s5 = inlined_call_operand.vmem [shape: f32[1,32], index: 5, kind: input, shape index: {}]   ;;  %s1385_s6 = inlined_call_operand.vmem [shape: bf16[32,128], index: 6, kind: input, shape index: {}]   ;;  %s1386_s7 = inlined_call_operand.vmem [shape: f32[1,128], index: 7, kind: input, shape index: {}]   ;;  %s1387_s8 = inlined_call_operand.vmem [shape: bf16[128,32], index: 8, kind: input, shape index: {}]   ;;  %s1388_s9 = inlined_call_operand.vmem [shape: f32[1,32], index: 9, kind: input, shape index: {}]   ;;  %s1389_s10 = inlined_call_operand.vmem [shape: f32[1,32], index: 10, kind: input, shape index: {}]   ;;  %s1390_s11 = inlined_call_operand.vmem [shape: f32[1,32], index: 11, kind: input, shape index: {}]   ;;  %s1391_s12 = inlined_call_operand.hbm [shape: f32[2,8,32], index: 12, kind: output, shape index: {}]  }
   0x1   :  { %1394 = sst [smem:[#allocation7_spill]] %s1379_s0 }
   0x2   :  { %1395 = sst [smem:[#allocation8_spill]] %s1381_s2 }
   0x3   :  { %17 = vsyncpa [#allocation3], 0 }
   0x4   :  { %19 = vsyncpa [#allocation3 + $0x1], 0  ;;  %s1180_s21 = smov 0   ;;  %s1182_s22 = smov 0  }
   0x5   :  { %s1184_s23 = smov 0   ;;  %s1186_s24 = smov 0  }
   0x6   :  { %s1188_s25 = smov 0   ;;  %s1190_s26 = smov 0  }
   0x7 LB: > { %1396 = sst [smem:[#allocation5_spill]] %s1106_s25  ;;  %s875_s27 = sadd.s32 4294967295, %s1110_s26   ;;  %s1110_s26 = sphi %s1190_s26, %s25_s26   ;;  %s1106_s25 = sphi %s1188_s25, %s1403_s25   ;;  %s1102_s24 = sphi %s1186_s24, %s1402_s24   ;;  %s1098_s23 = sphi %s1184_s23, %s1406_s23   ;;  %s1094_s22 = sphi %s1182_s22, %s1405_s22   ;;  %s1090_s21 = sphi %s1180_s21, %s1404_s21  }
   0x8   : > { %s876_s28 = sadd.s32 4294967294, %s1110_s26   ;;  %s37_s29 = sadd.s32 1, %s1106_s25 }
   0x9   : > { %s312_s30 = sadd.s32 1, %s1098_s23  ;;  %p39_p0 = scmp.ge.s32.totalorder %s37_s29, 2 }
   0xa   : > { %p322_p1 = scmp.ne.s32.totalorder %s1098_s23, %s1094_s22  ;;  %p323_p2 = scmp.eq.s32.totalorder %s875_s27, 1 }
   0xb   : > { %p328_p3 = scmp.ne.s32.totalorder %s1094_s22, %s1090_s21  ;;  %s1408_s29 = smov (%p39_p0, %s37_s29), 0 }
   0xc   : > { %1397 = sst [smem:[#allocation6_spill]] %s1408_s29  ;;  %p1220_p4 = por %p323_p2, %p322_p1 }
   0xd   : > { %p329_p5 = scmp.eq.s32.totalorder %s876_s28, 1  ;;  %s307_s14 = ssub.s32 %s1106_s25, %s1408_s29 }
   0xe   : > { %p879_p6 = scmp.ge.s32.totalorder %s1110_s26, 1  ;;  %p310_p7 = scmp.eq.s32.totalorder %s307_s14, 0 }
   0xf   : > { %p1227_p8 = por %p329_p5, %p328_p3  ;;  %p397_p9 = scmp.lt.s32.totalorder %s1110_s26, 3 }
  0x10   : > { %s1233_s16 = scalar_select %p310_p7, %s1098_s23, %s312_s30  }
  0x11   : > { %p398_p10 = pnand %p879_p6, %p397_p9 }
  0x12   : > { %s1400_s2 = sld [smem:[#allocation8_spill]] (!%p398_p10)  ;;  %v1112_v1 = vmov (!%p398_p10), 0.0   ;;  %vm1113_vm0 = vmmov (!%p398_p10), 0   ;;  %p448_p11 = scmp.lt.s32.totalorder (!%p398_p10), %s1102_s24, 1  ;;  %vm487_vm1 = vcmask (!%p398_p10), 261120   ;;  %v1018_v18 = vld [vmem:[%s1385_s6] sm:$0xff] (!%p398_p10)  }
  0x13   : > { %401 = sbr.rel (%p398_p10) target bundleno = 1324 (0x52c), region = 68  ;;  %923 = vmatprep.subr.bf16.mxu1 (!%p398_p10), %v1112_v1  ;;  %939 = vmatprep.subr.bf16.mxu0 (!%p398_p10), %v1112_v1  ;;  %s1401_s0 = sld [smem:[#allocation7_spill]] (!%p398_p10)  ;;  %v883_v4 = vld [vmem:[%s1382_s3] ss:$0 sm:$0xff] (!%p398_p10)  ;;  %v1019_v19 = vld [vmem:[%s1385_s6 + $0x8] sm:$0xff] (!%p398_p10)   ;;  %v1022_v22 = vld [vmem:[%s1387_s8 + $0x10] sm:$0xff] (!%p398_p10)  }
  0x14   : > { %927 = vmatprep.mubr.msk.bf16.mxu1 (!%p398_p10), %vm1113_vm0, %v1112_v1  ;;  %955 = vmatprep.mubr.msk.bf16.mxu0 (!%p398_p10), %vm1113_vm0, %v1112_v1  ;;  %v1020_v20 = vld [vmem:[%s1387_s8] sm:$0xff] (!%p398_p10)   ;;  %v1021_v21 = vld [vmem:[%s1387_s8 + $0x8] sm:$0xff] (!%p398_p10)   ;;  %v1023_v23 = vld [vmem:[%s1387_s8 + $0x18] sm:$0xff] (!%p398_p10)   ;;  %s445_s14 = sand.u32 (!%p398_p10), 1, %s1094_s22  }
  0x15   : > { %940 = vmatpush3.bf16.msra.mxu0 (!%p398_p10), %v1020_v20  ;;  %v1024_v24 = vld [vmem:[%s1387_s8 + $0x20] sm:$0xff] (!%p398_p10)   ;;  %v1025_v25 = vld [vmem:[%s1387_s8 + $0x28] sm:$0xff] (!%p398_p10)   ;;  %v1026_v36 = vld [vmem:[%s1387_s8 + $0x30] sm:$0xff] (!%p398_p10)  }
  0x16   : > { %941 = vmatprep.subr.bf16.mxu0 (!%p398_p10), %v1112_v1  ;;  %v887_v30 = vld [vmem:[%s1383_s4] ss:$0 sm:$0xff] (!%p398_p10)  ;;  %v1027_v37 = vld [vmem:[%s1387_s8 + $0x38] sm:$0xff] (!%p398_p10)  }
  0x17   : > { %v888_v32 = vld [vmem:[%s1384_s5] ss:$0 sm:$0xff] (!%p398_p10) }
  0x18   : > { %v1016_v0 = vld [vmem:[%s1400_s2] sm:$0xff] (!%p398_p10)   ;;  %v1017_v2 = vld [vmem:[%s1400_s2 + $0x8] sm:$0xff] (!%p398_p10)  }
  0x19   : > { %924 = vmatpush3.bf16.msra.mxu1 (!%p398_p10), %v1016_v0  ;;  %942 = vmatpush3.bf16.msra.mxu0 (!%p398_p10), %v1021_v21  ;;  %v889_v38 = vld [vmem:[%s1386_s7] ss:$0 sm:$0xff] (!%p398_p10) }
  0x1a   : > { %925 = vmatprep.subr.bf16.mxu1 %v1112_v1  ;;  %s449_s27 = scalar_select %p448_p11, %s1102_s24, 1  ;;  %943 = vmatprep.subr.bf16.mxu0 %v1112_v1  ;;  %v893_v46 = vld [vmem:[%s1388_s9] ss:$0 sm:$0xff] }
  0x1b   : > { %v902_v63 = vld [vmem:[%s1389_s10] ss:$0 sm:$0xff] }
  0x1c   : > { %s881_s28 = sshll.u32 %s449_s27, 2  ;;  %s882_s18 = sshll.u32 %s449_s27, 3 }
  0x1d   : > { %926 = vmatpush3.bf16.msra.mxu1 %v1017_v2  ;;  %s454_s17 = scalar_lea.vmem %s1401_s0, %s881_s28  ;;  %s461_s2 = scalar_lea.vmem %s1380_s1, %s882_s18  ;;  %944 = vmatpush3.bf16.msra.mxu0 %v1022_v22 }
  0x1e   : > { %931 = vmatprep.subr.bf16.mxu1 %v1112_v1  ;;  %v463_v3 = vld [vmem:[%s454_s17] sm:$0xf]  ;;  %945 = vmatprep.subr.bf16.mxu0 %v1112_v1  ;;  %s880_s17 = sshll.u32 %s445_s14, 3  ;;  %s775_s18 = scalar_lea.sflag [#allocation3], %s445_s14 }
  0x1f   : > { %v531_v6 = vld [vmem:[%s461_s2] sm:$0xff]  ;;  %s905_s2 = sshll.u32 %s1102_s24, 7  ;;  %s447_s29 = scalar_lea.vmem [#allocation2], %s880_s17 }
  0x20   : > { %928 = vmatmul.mubr.msk.bf16.vlgmr.msra.gmra.mrb[0].mxu1 %vm487_vm1, %v463_v3  ;;  %s789_s27 = sshll.u32 %s447_s29, 4  ;;  %s1331_s0 = scalar_lea.hbm %s1391_s12, %s905_s2  ;;  %s1333_s27 = int_to_ptr.vmem [resolvable:$true] %s789_s27 }
  0x21   : > { %935 = vmatprep.mubr.msk.bf16.mxu1 %vm1113_vm0, %v1112_v1  ;;  %932 = vmatpush3.bf16.msra.mxu1 %v1018_v18  ;;  %s1032_s19 = scalar_lea.vmem %s1333_s27, 128  ;;  %s1114_s24 = smov [#allocation2]  }
  0x22   : > { %933 = vmatprep.subr.bf16.mxu1 %v1112_v1  ;;  %946 = vmatpush3.bf16.msra.mxu0 %v1023_v23  ;;  %p1033_p12 = scmp.ne.s32.totalorder %s1333_s27, %s1032_s19  ;;  %s1036_s17 = sshll.u32 %s1114_s24, 4  ;;  %s1037_s17 = int_to_ptr.vmem [resolvable:$false] %s1036_s17 }
  0x23   : > { %947 = vmatprep.subr.bf16.mxu0 %v1112_v1  ;;  %s1038_s20 = scalar_lea.vmem %s1037_s17, 256  ;;  %p1039_p1 = scmp.lt.s32.totalorder %s1333_s27, %s1037_s17 }
  0x24   : > { %p1034_p13 = pnand %p1033_p12, %p1220_p4  ;;  %p1040_p2 = scmp.lt.s32.totalorder %s1038_s20, %s1032_s19 }
  0x25   : > { %934 = vmatpush3.bf16.msra.mxu1 %v1019_v19 }
  0x26   : > { %948 = vmatpush3.bf16.msra.mxu0 %v1024_v24  ;;  %p1035_p0 = pneg %p1034_p13  ;;  %p1041_p3 = por %p1040_p2, %p1039_p1 }
  0x27   : > { %949 = vmatprep.subr.bf16.mxu0 %v1112_v1 }
  0x28   : > { %p1042_p5 = pnand %p1041_p3, %p1035_p0 }
  0x2a   : > { %950 = vmatpush3.bf16.msra.mxu0 %v1025_v25 }
  0x2b   : > { %951 = vmatprep.subr.bf16.mxu0 %v1112_v1 }
  0x2e   : > { %952 = vmatpush3.bf16.msra.mxu0 %v1026_v36 }
  0x2f   : > { %953 = vmatprep.subr.bf16.mxu0 %v1112_v1  ;;  %v903_v1 = vld [vmem:[%s1390_s11] ss:$0 sm:$0xff] }
  0x32   : > { %954 = vmatpush3.bf16.msra.mxu0 %v1027_v37 }
  0xf3   : > { %v525_v5 = vpop.f32.mrb[0].mxu1 }
  0xf4   : > { %v526_v7 = vadd.f32 %v883_v4, %v525_v5  ;;  %v929_v8 = vpop.f32.mrb[1].mxu1 }
  0xf5   : > { %v528_v9 = vpop.f32.mrb[2].mxu1 }
  0xf6   : > { %v1260_v10 = vadd.f32 %v531_v6, %v526_v7  ;;  %v930_v11 = vpop.f32.mrb[3].mxu1 }
  0xf8   : > { %v535_v12 = vsel %vm487_vm1, %v1260_v10, 0.0 }
  0xf9   : > { %536 = vadd.xlane.f32.xlu0 %v535_v12 }
 0x186   : > { %v537_v13 = vpop.xlane.xlu0 %536 }
 0x187   : > { %v539_v14 = vmul.f32 0.03125, %v537_v13 }
 0x189   : > { %v540_v15 = vsub.f32 %v1260_v10, %v539_v14 }
 0x18b   : > { %v541_v16 = vmul.f32 %v540_v15, %v540_v15 }
 0x18d   : > { %v542_v17 = vsel %vm487_vm1, %v541_v16, 0.0 }
 0x18e   : > { %543 = vadd.xlane.f32.xlu0 %v542_v17 }
 0x21b   : > { %v544_v26 = vpop.xlane.xlu0 %543 }
 0x21c   : > { %v545_v27 = vmul.f32 0.03125, %v544_v26 }
 0x21e   : > { %v546_v28 = vadd.f32 1e-05, %v545_v27 }
 0x220   : > { %1028 = vrsqrt.f32 %v546_v28 }
 0x22a   : > { %v1029_v29 = vpop.eup %1028 }
 0x22b   : > { %v548_v31 = vmul.f32 %v1029_v29, %v540_v15 }
 0x22d   : > { %v555_v33 = vmul.f32 %v887_v30, %v548_v31 }
 0x22f   : > { %v562_v34 = vadd.f32 %v888_v32, %v555_v33 }
 0x231   : > { %v563_v35 = vpack.c.bf16 %v562_v34, %v562_v34 }
 0x233   : > { %936 = vmatmul.mubr.msk.bf16.vlgmr.msra.gmra.mrb[4].mxu1 %vm487_vm1, %v563_v35 }
 0x306   : > { %v624_v39 = vpop.f32.mrb[4].mxu1 }
 0x307   : > { %v625_v40 = vadd.f32 %v889_v38, %v624_v39  ;;  %v937_v41 = vpop.f32.mrb[5].mxu1 }
 0x308   : > { %v627_v42 = vpop.f32.mrb[6].mxu1 }
 0x309   : > { %v630_v43 = vmax.f32 %v625_v40, 0.0  ;;  %v938_v44 = vpop.f32.mrb[7].mxu1 }
 0x30b   : > { %v631_v45 = vpack.c.bf16 %v630_v43, %v630_v43 }
 0x30d   : > { %956 = vmatmul.mubr.bf16.vlgmr.msra.gmra.mrb[0].mxu0 %v631_v45 }
 0x3e0   : > { %v737_v47 = vpop.f32.mrb[0].mxu0 }
 0x3e1   : > { %v738_v48 = vadd.f32 %v893_v46, %v737_v47  ;;  %v957_v49 = vpop.f32.mrb[1].mxu0 }
 0x3e2   : > { %v740_v50 = vpop.f32.mrb[2].mxu0 }
 0x3e3   : > { %v958_v51 = vpop.f32.mrb[3].mxu0  ;;  %v743_v52 = vadd.f32 %v738_v48, %v1260_v10 }
 0x3e5   : > { %v746_v53 = vsel %vm487_vm1, %v743_v52, 0.0 }
 0x3e6   : > { %747 = vadd.xlane.f32.xlu1 %v746_v53 }
 0x473   : > { %v748_v54 = vpop.xlane.xlu1 %747 }
 0x474   : > { %v749_v55 = vmul.f32 0.03125, %v748_v54 }
 0x476   : > { %v750_v56 = vsub.f32 %v743_v52, %v749_v55 }
 0x478   : > { %v751_v57 = vmul.f32 %v750_v56, %v750_v56 }
 0x47a   : > { %v752_v58 = vsel %vm487_vm1, %v751_v57, 0.0 }
 0x47b   : > { %753 = vadd.xlane.f32.xlu1 %v752_v58 }
 0x508   : > { %v754_v59 = vpop.xlane.xlu1 %753 }
 0x509   : > { %v755_v60 = vmul.f32 0.03125, %v754_v59 }
 0x50b   : > { %v756_v61 = vadd.f32 1e-05, %v755_v60 }
 0x50d   : > { %1030 = vrsqrt.f32 %v756_v61 }
 0x517   : > { %v1031_v62 = vpop.eup %1030 }
 0x518   : > { %v758_v0 = vmul.f32 %v1031_v62, %v750_v56 }
 0x51a   : > { %v765_v2 = vmul.f32 %v902_v63, %v758_v0 }
 0x51c   : > { %v772_v3 = vadd.f32 %v903_v1, %v765_v2 }
 0x51e   : > { %773 = vst.msk [vmem:[%s447_s29] sm:$0xff] %vm487_vm1, %v772_v3 }
 0x51f   : > { %1045 = shalt.err (!%p1042_p5)
}
 0x520   : > { %s1046_s14 = scalar_lea.hbm %s1331_s0, 128  ;;  %s1050_s29 = scalar_lea.hbm %s1391_s12, 256 }
 0x521   : > { %p1047_p6 = scmp.ne.s32.totalorder %s1331_s0, %s1046_s14  ;;  %p1051_p10 = scmp.lt.u32.totalorder %s1331_s0, %s1391_s12 }
 0x522   : > { %p1052_p11 = scmp.lt.u32.totalorder %s1050_s29, %s1046_s14  ;;  %p1054_p13 = scmp.lt.u32.totalorder %s1046_s14, %s1331_s0 }
 0x523   : > { %p1048_p7 = pnand %p1047_p6, %p1220_p4 }
 0x524   : > { %p1053_p12 = por %p1052_p11, %p1051_p10 }
 0x525   : > { %p1049_p9 = pneg %p1048_p7 }
 0x526   : > { %p1055_p0 = por %p1054_p13, %p1053_p12 }
 0x528   : > { %p1056_p1 = pnand %p1055_p0, %p1049_p9 }
 0x52a   : > { %1059 = shalt.err (!%p1056_p1)
}
 0x52b   : > { %959 = dma.vmem_to_hbm [thread:$0]  (%p1220_p4), %s1333_s27, 128, %s1331_s0, %s775_s18  }
 0x52c PF: > { %p965_p2 = scmp.ge.s32.totalorder %s1110_s26, 2  ;;  %s801_s19 = sand.u32 1, %s1090_s21  }
 0x52d   : > { %s802_s24 = scalar_lea.sflag [#allocation3], %s801_s19 }
 0x52e   : > { %p962_p3 = pnand %p965_p2, %p1227_p8 }
 0x530   : > { %1085 = dma.done.wait (!%p962_p3), %s802_s24, 128  }
 0x531   : > { %1087 = vsyncadd (!%p962_p3), %s802_s24, 4294967168  ;;  %s25_s26 = sadd.s32 1, %s1110_s26   ;;  %s1402_s24 = sld [smem:[#allocation5_spill]] }
 0x532   : > { %p22_p5 = scmp.ge.s32.totalorder %s25_s26, 4   ;;  %s1403_s25 = sld [smem:[#allocation6_spill]] }
 0x533   : > { %s1404_s21 = smov %s1094_s22  ;;  %s1405_s22 = smov %s1098_s23 }
 0x534   : > { %s1406_s23 = smov %s1233_s16  ;;  %24 = sbr.rel (!%p22_p5) target bundleno = 7 (0x7), region = 106 }
 0x53b   :  { %807 = vsyncpa [#allocation3], 1 }
 0x53c   :  { %809 = vsyncpa [#allocation3 + $0x1], 1 }

</bundles_post_ra>
